<compile_context>
chip_gen: v6e
topology: v6e:2x2x1
jax: 0.10.0
libtpu: 0.0.40
codegen_flags: <defaults>
</compile_context>

<pallas_src>
import jax
import jax.numpy as jnp
import numpy as np
from jax.experimental import pallas as pl
from jax.experimental.pallas import tpu as pltpu


def _make_kernel(L, H, tq, bp, buf_dtype, rec_dtype, addin_live,
                 max_unroll_steps):
    LH = L * H
    total_steps = tq + L - 1
    unrolled = total_steps <= max_unroll_steps
    assert unrolled or not addin_live  # live projection only with static steps

    def kernel(x_ref, w_in_ref, wbig_ref, bias_ref, w_out_ref, b_out_ref,
               y_ref, h_ref, buf_ref, *scratch):
        c = pl.program_id(0)

        @pl.when(c == 0)
        def _():
            h_ref[...] = jnp.zeros_like(h_ref)

        # Hoisted, chunk-wide input projection (+ every layer's bias):
        # one tall matmul (TQ*Bp, I) @ (I, L*H).
        addin_full = (jnp.dot(x_ref[...], w_in_ref[...],
                              preferred_element_type=jnp.float32)
                      + bias_ref[...])                      # (tq*bp, LH) f32
        if addin_live:
            addin_ref = None
        else:
            addin_ref = scratch[0]
            addin_ref[...] = addin_full

        bias_big = bias_ref[...]                            # (1, LH) f32
        wbig = wbig_ref[...]                                # (LH, LH)

        def addin_at(t):
            if addin_live:                                  # static t, live value
                return addin_full[t * bp:(t + 1) * bp, :]
            if isinstance(t, int):
                return addin_ref[pl.ds(t * bp, bp), :]
            return addin_ref[pl.ds(pl.multiple_of(t * bp, bp), bp), :]

        def store_out(t, h_last):
            start = t * bp if isinstance(t, int) else pl.multiple_of(t * bp, bp)
            buf_ref[pl.ds(start, bp), :] = h_last.astype(buf_dtype)

        def do_step(state, addin_term, t_last, write_buf, col_mask):
            # Single fused matmul: recurrent (W_hh) + inter-layer (W_ih) terms
            # for every layer on this wavefront.
            z = jnp.dot(state.astype(rec_dtype), wbig,
                        preferred_element_type=jnp.float32)
            z = z + (bias_big if addin_term is None else addin_term)
            h_new = jnp.tanh(z)
            if write_buf:                                   # off the latency chain
                store_out(t_last, h_new[:, (L - 1) * H:])
            if col_mask is None:                            # steady state
                return h_new
            return jnp.where(col_mask, h_new, state)        # warmup / drain

        def static_step(k, state):
            valid = [(l <= k) and (k - l < tq) for l in range(L)]
            if all(valid):
                col_mask = None
            else:
                lane = jax.lax.broadcasted_iota(jnp.int32, (1, LH), 1)
                col_mask = None
                for l in range(L):
                    if valid[l]:
                        blk = (lane >= l * H) & (lane < (l + 1) * H)
                        col_mask = blk if col_mask is None else (col_mask | blk)
            addin_term = addin_at(k) if k < tq else None
            t_last = k - (L - 1)
            return do_step(state, addin_term, t_last, 0 <= t_last < tq, col_mask)

        state = h_ref[...]                                  # (bp, LH) f32, carried

        if unrolled:
            for k in range(total_steps):
                state = static_step(k, state)
        else:
            steady_lo, steady_hi = L - 1, tq                # all-layers-valid region
            for k in range(min(steady_lo, total_steps)):    # warmup (static)
                state = static_step(k, state)
            if steady_hi > steady_lo:
                def body(k, st):
                    return do_step(st, addin_at(k), k - (L - 1), True, None)
                state = jax.lax.fori_loop(steady_lo, steady_hi, body, state,
                                          unroll=min(8, steady_hi - steady_lo))
            for k in range(max(steady_lo, tq), total_steps):  # drain (static)
                state = static_step(k, state)

        h_ref[...] = state                                  # final hidden per layer

        # Batched linear head over the whole chunk, lane-dense (1, tq*bp) row.
        yrow = jax.lax.dot_general(
            w_out_ref[...], buf_ref[...],
            dimension_numbers=(((1,), (1,)), ((), ())),
            preferred_element_type=jnp.float32)
        y_ref[0] = yrow + b_out_ref[...]

    return kernel


def rrn_net_forward(x, w_ihs, w_hhs, b_ihs, b_hhs, w_out, b_out, *,
                    time_chunk=None, matmul_dtype=jnp.float32,
                    recurrent_dtype=jnp.float32, max_unroll_steps=64,
                    vmem_budget_bytes=12 << 20):
    """Pallas implementation of rrn_net.forward.

    x      : (S, B, I) float32
    w_ihs  : list of (H, in_l) per layer (in_0 = I, else H)
    w_hhs  : list of (H, H);  b_ihs, b_hhs : list of (H,)
    w_out  : (1, H), b_out : (1,)
    returns (y (S, B, 1), hidden (L, B, H))
    """
    S, B, I = x.shape
    L = len(w_ihs)
    H = w_hhs[0].shape[0]
    LH = L * H
    f32 = jnp.float32

    Bp = ((B + 7) // 8) * 8                  # sublane-aligned batch
    xdt = jnp.dtype(matmul_dtype)
    bufdt = jnp.dtype(matmul_dtype)

    def chunk_bytes(tq):
        return (2 * tq * Bp * I * xdt.itemsize      # x block (double-buffered)
                + tq * Bp * H * bufdt.itemsize      # last-layer output scratch
                + tq * Bp * LH * 4                  # projection (+bias) slab
                + 2 * tq * Bp * 4)                  # y block

    if time_chunk is None:
        # Default: whole sequence in one chunk (lane-dense, zero per-step grid
        # overhead) when it fits the budget; else largest divisor of S that fits.
        TQ = S
        if chunk_bytes(TQ) > vmem_budget_bytes:
            fits = [d for d in range(1, S + 1)
                    if S % d == 0 and chunk_bytes(d) <= vmem_budget_bytes]
            TQ = max(fits) if fits else 1
    else:
        TQ = max(1, min(S, int(time_chunk)))
        while S % TQ:                         # keep S divisible (chunked carry)
            TQ -= 1
    C = S // TQ

    # --- fused weights (host-side prep) ------------------------------------
    # w_in: layer-0 input projection, zero-padded to width L*H so the hoisted
    # chunk matmul directly produces the full-width per-step additive term.
    w_in = jnp.asarray(w_ihs[0], f32).T                      # (I, H)
    if L > 1:
        w_in = jnp.pad(w_in, ((0, 0), (0, (L - 1) * H)))
    w_in = w_in.astype(matmul_dtype)                         # (I, LH)

    # Upper-block-triangular fused recurrent/inter-layer weight.
    wbig = jnp.zeros((LH, LH), f32)
    for l in range(L):
        wbig = wbig.at[l * H:(l + 1) * H, l * H:(l + 1) * H].set(
            jnp.asarray(w_hhs[l], f32).T)
        if l:
            wbig = wbig.at[(l - 1) * H:l * H, l * H:(l + 1) * H].set(
                jnp.asarray(w_ihs[l], f32).T)
    wbig = wbig.astype(recurrent_dtype)

    bias_big = jnp.concatenate(
        [jnp.asarray(b_ihs[l], f32) + jnp.asarray(b_hhs[l], f32)
         for l in range(L)]).reshape(1, LH)

    w_out_row = jnp.asarray(w_out, f32).reshape(1, H).astype(matmul_dtype)
    b_out_2d = jnp.asarray(b_out, f32).reshape(1, 1)

    # x: pad batch to sublane multiple, flatten time-major, host-cast to the
    # matmul dtype (halves the only HBM-streamed input in the bf16 path).
    xj = jnp.asarray(x, f32)
    if Bp != B:
        xj = jnp.pad(xj, ((0, 0), (0, Bp - B), (0, 0)))
    x_flat = xj.reshape(S * Bp, I).astype(matmul_dtype)

    total_steps = TQ + L - 1
    unrolled = total_steps <= max_unroll_steps
    addin_live = unrolled and (TQ * Bp * LH * 4 <= 64 * 1024)

    kernel = _make_kernel(L, H, TQ, Bp, bufdt, jnp.dtype(recurrent_dtype),
                          addin_live, max_unroll_steps)

    in_specs = [
        pl.BlockSpec((TQ * Bp, I), lambda c: (c, 0)),
        # Grid-constant weights (full-shape blocks, constant index map -> no
        # re-fetch).  For very large H on v7x, single-buffer these with
        # pipeline_mode=pl.Buffered(1); negligible at these sizes.
        pl.BlockSpec(w_in.shape, lambda c: (0, 0)),
        pl.BlockSpec((LH, LH), lambda c: (0, 0)),
        pl.BlockSpec((1, LH), lambda c: (0, 0)),
        pl.BlockSpec((1, H), lambda c: (0, 0)),
        pl.BlockSpec((1, 1), lambda c: (0, 0)),
    ]
    out_shape = (
        jax.ShapeDtypeStruct((C, 1, TQ * Bp), jnp.float32),   # y (lane-dense rows)
        jax.ShapeDtypeStruct((Bp, LH), jnp.float32),          # hidden state
    )
    out_specs = (
        pl.BlockSpec((1, 1, TQ * Bp), lambda c: (c, 0, 0)),
        pl.BlockSpec((Bp, LH), lambda c: (0, 0)),             # resident state
    )
    scratch_shapes = [pltpu.VMEM((TQ * Bp, H), bufdt)]
    if not addin_live:
        scratch_shapes.append(pltpu.VMEM((TQ * Bp, LH), jnp.float32))

    weight_bytes = sum(int(a.size) * a.dtype.itemsize
                       for a in (w_in, wbig, bias_big, w_out_row, b_out_2d))
    est = 2 * weight_bytes + chunk_bytes(TQ) + 2 * Bp * LH * 4
    vmem_limit = int(min(max(4 * est, 16 << 20), 48 << 20))

    # Note: for Bp >= 16 on v7x one could add a leading "parallel" grid axis
    # sharding the batch across the two TensorCores; skipped here (B is small).
    y3, h_state = pl.pallas_call(
        kernel,
        out_shape=out_shape,
        grid=(C,),
        in_specs=in_specs,
        out_specs=out_specs,
        scratch_shapes=scratch_shapes,
        compiler_params=pltpu.CompilerParams(
            dimension_semantics=("arbitrary",),    # time carries a recurrence
            vmem_limit_bytes=vmem_limit),
    )(x_flat, w_in, wbig, bias_big, w_out_row, b_out_2d)

    y = y3.reshape(S, Bp)[:, :B].reshape(S, B, 1)
    hidden = h_state[:B].reshape(B, L, H).transpose(1, 0, 2)
    return y, hidden


def rrn_net_ref(x, w_ihs, w_hhs, b_ihs, b_hhs, w_out, b_out):
    """Pure-JAX reference mirroring torch.nn.RNN(tanh) + Linear."""
    S, B, _ = x.shape
    L = len(w_ihs)
    H = w_hhs[0].shape[0]
    h = jnp.zeros((L, B, H), jnp.float32)
    ys = []
    for t in range(S):
        inp = x[t]
        new_h = []
        for l in range(L):
            hn = jnp.tanh(inp @ w_ihs[l].T + h[l] @ w_hhs[l].T
                          + b_ihs[l] + b_hhs[l])
            new_h.append(hn)
            inp = hn
        h = jnp.stack(new_h)
        ys.append(inp @ w_out.T + b_out)
    return jnp.stack(ys), h


if __name__ == "__main__":
    # Small shapes consistent with nn.RNN(input_size, num_hidden, num_layers).
    S, B, I, H, L = 16, 4, 16, 32, 2

    key = jax.random.PRNGKey(0)
    keys = jax.random.split(key, 4 * L + 3)
    bound = 1.0 / np.sqrt(H)

    w_ihs, w_hhs, b_ihs, b_hhs = [], [], [], []
    ki = 0
    for l in range(L):
        in_l = I if l == 0 else H
        w_ihs.append(jax.random.uniform(keys[ki], (H, in_l), jnp.float32,
                                        -bound, bound)); ki += 1
        w_hhs.append(jax.random.uniform(keys[ki], (H, H), jnp.float32,
                                        -bound, bound)); ki += 1
        b_ihs.append(jax.random.uniform(keys[ki], (H,), jnp.float32,
                                        -bound, bound)); ki += 1
        b_hhs.append(jax.random.uniform(keys[ki], (H,), jnp.float32,
                                        -bound, bound)); ki += 1
    w_out = jax.random.uniform(keys[ki], (1, H), jnp.float32,
                               -bound, bound); ki += 1
    b_out = jax.random.uniform(keys[ki], (1,), jnp.float32,
                               -bound, bound); ki += 1
    x = jax.random.normal(keys[ki], (S, B, I), jnp.float32)

    y_ref, hidden_ref = rrn_net_ref(x, w_ihs, w_hhs, b_ihs, b_hhs,
                                    w_out, b_out)

    # 1) Default path: f32, TQ = S (single lane-dense chunk), fully unrolled,
    #    live projection slab (this is the v5e-friendly exact path).
    y, hidden = rrn_net_forward(x, w_ihs, w_hhs, b_ihs, b_hhs, w_out, b_out)
    y = jax.block_until_ready(y)
    hidden = jax.block_until_ready(hidden)
    np.testing.assert_allclose(np.asarray(y), np.asarray(y_ref),
                               rtol=5e-3, atol=5e-3)
    np.testing.assert_allclose(np.asarray(hidden), np.asarray(hidden_ref),
                               rtol=5e-3, atol=5e-3)
    assert y.shape == (S, B, 1)
    assert hidden.shape == (L, B, H)

    # 2) bf16 matmul-operand path (v6e/v7x): host-cast x, bf16 projections,
    #    bf16 output scratch/head, bf16 recurrence; f32 accumulation/tanh.
    y_bf, hidden_bf = rrn_net_forward(x, w_ihs, w_hhs, b_ihs, b_hhs,
                                      w_out, b_out,
                                      matmul_dtype=jnp.bfloat16,
                                      recurrent_dtype=jnp.bfloat16)
    y_bf = jax.block_until_ready(y_bf)
    hidden_bf = jax.block_until_ready(hidden_bf)
    np.testing.assert_allclose(np.asarray(y_bf), np.asarray(y_ref),
                               rtol=5e-2, atol=5e-2)
    np.testing.assert_allclose(np.asarray(hidden_bf), np.asarray(hidden_ref),
                               rtol=5e-2, atol=5e-2)

    # 3) Chunked + fori_loop path: 2 time chunks (cross-chunk state carry) and
    #    a forced lax.fori_loop steady state with scratch-resident projections.
    y_c, hidden_c = rrn_net_forward(x, w_ihs, w_hhs, b_ihs, b_hhs,
                                    w_out, b_out,
                                    time_chunk=8, max_unroll_steps=4)
    y_c = jax.block_until_ready(y_c)
    hidden_c = jax.block_until_ready(hidden_c)
    np.testing.assert_allclose(np.asarray(y_c), np.asarray(y_ref),
                               rtol=5e-3, atol=5e-3)
    np.testing.assert_allclose(np.asarray(hidden_c), np.asarray(hidden_ref),
                               rtol=5e-3, atol=5e-3)

    print("KERNEL_OK")
</pallas_src>

<mosaic_0001>
module attributes {stable_mosaic.version = 11 : i64} {
  func.func @kernel(%arg0: i32, %arg1: memref<128x16xf32, #tpu.memory_space<vmem>>, %arg2: memref<16x64xf32, #tpu.memory_space<vmem>>, %arg3: memref<64x64xf32, #tpu.memory_space<vmem>>, %arg4: memref<1x64xf32, #tpu.memory_space<vmem>>, %arg5: memref<1x32xf32, #tpu.memory_space<vmem>>, %arg6: memref<1x1xf32, #tpu.memory_space<vmem>>, %arg7: memref<1x1x128xf32, #tpu.memory_space<vmem>>, %arg8: memref<8x64xf32, #tpu.memory_space<vmem>>, %arg9: memref<128x32xf32, #tpu.memory_space<vmem>>) attributes {dimension_semantics = [#tpu.dimension_semantics<arbitrary>], iteration_bounds = array<i64: 1>, scalar_prefetch = 0 : i64, scratch_operands = 1 : i64, tpu.core_type = #tpu.core_type<tc>, window_params = [{transform_indices = @transform_0, window_bounds = array<i64: 128, 16>}, {pipeline_mode = #tpu.pipeline_mode<synchronous>, transform_indices = @transform_1, window_bounds = array<i64: 16, 64>}, {pipeline_mode = #tpu.pipeline_mode<synchronous>, transform_indices = @transform_2, window_bounds = array<i64: 64, 64>}, {pipeline_mode = #tpu.pipeline_mode<synchronous>, transform_indices = @transform_3, window_bounds = array<i64: 1, 64>}, {pipeline_mode = #tpu.pipeline_mode<synchronous>, transform_indices = @transform_4, window_bounds = array<i64: 1, 32>}, {pipeline_mode = #tpu.pipeline_mode<synchronous>, transform_indices = @transform_5, window_bounds = array<i64: 1, 1>}, {transform_indices = @transform_6, window_bounds = array<i64: 1, 1, 128>}, {pipeline_mode = #tpu.pipeline_mode<synchronous>, transform_indices = @transform_7, window_bounds = array<i64: 8, 64>}]} {
    %c0_i32 = arith.constant 0 : i32
    %0 = arith.cmpi eq, %arg0, %c0_i32 : i32
    %1 = arith.extui %0 : i1 to i32
    %c0_i32_0 = arith.constant 0 : i32
    %2 = arith.cmpi ne, %1, %c0_i32_0 : i32
    scf.if %2 {
      %cst_60 = arith.constant 0.000000e+00 : f32
      %140 = vector.broadcast %cst_60 : f32 to vector<8x64xf32>
      %c0_61 = arith.constant 0 : index
      %c0_62 = arith.constant 0 : index
      %141 = vector.load %arg8[%c0_61, %c0_62] : memref<8x64xf32, #tpu.memory_space<vmem>>, vector<8x64xf32>
      tpu.vector_store %arg8[%c0_61, %c0_62], %140 {strides = array<i32>} : memref<8x64xf32, #tpu.memory_space<vmem>>, vector<8x64xf32>,
    } else {
    }
    %c0 = arith.constant 0 : index
    %c0_1 = arith.constant 0 : index
    %3 = vector.load %arg1[%c0, %c0_1] : memref<128x16xf32, #tpu.memory_space<vmem>>, vector<128x16xf32>
    %c0_2 = arith.constant 0 : index
    %c0_3 = arith.constant 0 : index
    %4 = vector.load %arg2[%c0_2, %c0_3] : memref<16x64xf32, #tpu.memory_space<vmem>>, vector<16x64xf32>
    %cst = arith.constant dense<0.000000e+00> : vector<128x64xf32>
    %5 = tpu.matmul %3, %4, %cst {dimension_numbers = #tpu.dot_dimension_numbers<[1], [0], [0], [1], [0, 0, 1, 1], [], []>} : vector<128x16xf32>, vector<16x64xf32>, vector<128x64xf32> -> vector<128x64xf32>
    %c0_4 = arith.constant 0 : index
    %c0_5 = arith.constant 0 : index
    %6 = vector.load %arg4[%c0_4, %c0_5] : memref<1x64xf32, #tpu.memory_space<vmem>>, vector<1x64xf32>
    %7 = vector.broadcast %6 : vector<1x64xf32> to vector<128x64xf32>
    %8 = arith.addf %5, %7 : vector<128x64xf32>
    %c0_6 = arith.constant 0 : index
    %c0_7 = arith.constant 0 : index
    %9 = vector.load %arg4[%c0_6, %c0_7] : memref<1x64xf32, #tpu.memory_space<vmem>>, vector<1x64xf32>
    %c0_8 = arith.constant 0 : index
    %c0_9 = arith.constant 0 : index
    %10 = vector.load %arg3[%c0_8, %c0_9] : memref<64x64xf32, #tpu.memory_space<vmem>>, vector<64x64xf32>
    %c0_10 = arith.constant 0 : index
    %c0_11 = arith.constant 0 : index
    %11 = vector.load %arg8[%c0_10, %c0_11] : memref<8x64xf32, #tpu.memory_space<vmem>>, vector<8x64xf32>
    %12 = tpu.iota {dimensions = array<i32: 1>} : vector<1x64xi32>
    %c0_i32_12 = arith.constant 0 : i32
    %13 = vector.broadcast %c0_i32_12 : i32 to vector<1x64xi32>
    %14 = arith.cmpi sge, %12, %13 : vector<1x64xi32>
    %c32_i32 = arith.constant 32 : i32
    %15 = vector.broadcast %c32_i32 : i32 to vector<1x64xi32>
    %16 = arith.cmpi slt, %12, %15 : vector<1x64xi32>
    %17 = arith.andi %14, %16 : vector<1x64xi1>
    %18 = vector.extract_strided_slice %8 {offsets = [0, 0], sizes = [8, 64], strides = [1, 1]} : vector<128x64xf32> to vector<8x64xf32>
    %cst_13 = arith.constant dense<0.000000e+00> : vector<8x64xf32>
    %19 = tpu.matmul %11, %10, %cst_13 {dimension_numbers = #tpu.dot_dimension_numbers<[1], [0], [0], [1], [0, 0, 1, 1], [], []>} : vector<8x64xf32>, vector<64x64xf32>, vector<8x64xf32> -> vector<8x64xf32>
    %20 = arith.addf %19, %18 : vector<8x64xf32>
    %21 = math.tanh %20 : vector<8x64xf32>
    %22 = vector.shape_cast %17 : vector<1x64xi1> to vector<1x64xi1>
    %23 = vector.broadcast %22 : vector<1x64xi1> to vector<8x64xi1>
    %24 = arith.select %23, %21, %11 : vector<8x64xi1>, vector<8x64xf32>
    %25 = vector.extract_strided_slice %8 {offsets = [8, 0], sizes = [8, 64], strides = [1, 1]} : vector<128x64xf32> to vector<8x64xf32>
    %cst_14 = arith.constant dense<0.000000e+00> : vector<8x64xf32>
    %26 = tpu.matmul %24, %10, %cst_14 {dimension_numbers = #tpu.dot_dimension_numbers<[1], [0], [0], [1], [0, 0, 1, 1], [], []>} : vector<8x64xf32>, vector<64x64xf32>, vector<8x64xf32> -> vector<8x64xf32>
    %27 = arith.addf %26, %25 : vector<8x64xf32>
    %28 = math.tanh %27 : vector<8x64xf32>
    %29 = vector.extract_strided_slice %28 {offsets = [0, 32], sizes = [8, 32], strides = [1, 1]} : vector<8x64xf32> to vector<8x32xf32>
    %c0_15 = arith.constant 0 : index
    %c0_16 = arith.constant 0 : index
    %30 = vector.load %arg9[%c0_15, %c0_16] : memref<128x32xf32, #tpu.memory_space<vmem>>, vector<8x32xf32>
    tpu.vector_store %arg9[%c0_15, %c0_16], %29 {strides = array<i32>} : memref<128x32xf32, #tpu.memory_space<vmem>>, vector<8x32xf32>,
    %31 = vector.extract_strided_slice %8 {offsets = [16, 0], sizes = [8, 64], strides = [1, 1]} : vector<128x64xf32> to vector<8x64xf32>
    %cst_17 = arith.constant dense<0.000000e+00> : vector<8x64xf32>
    %32 = tpu.matmul %28, %10, %cst_17 {dimension_numbers = #tpu.dot_dimension_numbers<[1], [0], [0], [1], [0, 0, 1, 1], [], []>} : vector<8x64xf32>, vector<64x64xf32>, vector<8x64xf32> -> vector<8x64xf32>
    %33 = arith.addf %32, %31 : vector<8x64xf32>
    %34 = math.tanh %33 : vector<8x64xf32>
    %35 = vector.extract_strided_slice %34 {offsets = [0, 32], sizes = [8, 32], strides = [1, 1]} : vector<8x64xf32> to vector<8x32xf32>
    %c8 = arith.constant 8 : index
    %c0_18 = arith.constant 0 : index
    %36 = vector.load %arg9[%c8, %c0_18] : memref<128x32xf32, #tpu.memory_space<vmem>>, vector<8x32xf32>
    tpu.vector_store %arg9[%c8, %c0_18], %35 {strides = array<i32>} : memref<128x32xf32, #tpu.memory_space<vmem>>, vector<8x32xf32>,
    %37 = vector.extract_strided_slice %8 {offsets = [24, 0], sizes = [8, 64], strides = [1, 1]} : vector<128x64xf32> to vector<8x64xf32>
    %cst_19 = arith.constant dense<0.000000e+00> : vector<8x64xf32>
    %38 = tpu.matmul %34, %10, %cst_19 {dimension_numbers = #tpu.dot_dimension_numbers<[1], [0], [0], [1], [0, 0, 1, 1], [], []>} : vector<8x64xf32>, vector<64x64xf32>, vector<8x64xf32> -> vector<8x64xf32>
    %39 = arith.addf %38, %37 : vector<8x64xf32>
    %40 = math.tanh %39 : vector<8x64xf32>
    %41 = vector.extract_strided_slice %40 {offsets = [0, 32], sizes = [8, 32], strides = [1, 1]} : vector<8x64xf32> to vector<8x32xf32>
    %c16 = arith.constant 16 : index
    %c0_20 = arith.constant 0 : index
    %42 = vector.load %arg9[%c16, %c0_20] : memref<128x32xf32, #tpu.memory_space<vmem>>, vector<8x32xf32>
    tpu.vector_store %arg9[%c16, %c0_20], %41 {strides = array<i32>} : memref<128x32xf32, #tpu.memory_space<vmem>>, vector<8x32xf32>,
    %43 = vector.extract_strided_slice %8 {offsets = [32, 0], sizes = [8, 64], strides = [1, 1]} : vector<128x64xf32> to vector<8x64xf32>
    %cst_21 = arith.constant dense<0.000000e+00> : vector<8x64xf32>
    %44 = tpu.matmul %40, %10, %cst_21 {dimension_numbers = #tpu.dot_dimension_numbers<[1], [0], [0], [1], [0, 0, 1, 1], [], []>} : vector<8x64xf32>, vector<64x64xf32>, vector<8x64xf32> -> vector<8x64xf32>
    %45 = arith.addf %44, %43 : vector<8x64xf32>
    %46 = math.tanh %45 : vector<8x64xf32>
    %47 = vector.extract_strided_slice %46 {offsets = [0, 32], sizes = [8, 32], strides = [1, 1]} : vector<8x64xf32> to vector<8x32xf32>
    %c24 = arith.constant 24 : index
    %c0_22 = arith.constant 0 : index
    %48 = vector.load %arg9[%c24, %c0_22] : memref<128x32xf32, #tpu.memory_space<vmem>>, vector<8x32xf32>
    tpu.vector_store %arg9[%c24, %c0_22], %47 {strides = array<i32>} : memref<128x32xf32, #tpu.memory_space<vmem>>, vector<8x32xf32>,
    %49 = vector.extract_strided_slice %8 {offsets = [40, 0], sizes = [8, 64], strides = [1, 1]} : vector<128x64xf32> to vector<8x64xf32>
    %cst_23 = arith.constant dense<0.000000e+00> : vector<8x64xf32>
    %50 = tpu.matmul %46, %10, %cst_23 {dimension_numbers = #tpu.dot_dimension_numbers<[1], [0], [0], [1], [0, 0, 1, 1], [], []>} : vector<8x64xf32>, vector<64x64xf32>, vector<8x64xf32> -> vector<8x64xf32>
    %51 = arith.addf %50, %49 : vector<8x64xf32>
    %52 = math.tanh %51 : vector<8x64xf32>
    %53 = vector.extract_strided_slice %52 {offsets = [0, 32], sizes = [8, 32], strides = [1, 1]} : vector<8x64xf32> to vector<8x32xf32>
    %c32 = arith.constant 32 : index
    %c0_24 = arith.constant 0 : index
    %54 = vector.load %arg9[%c32, %c0_24] : memref<128x32xf32, #tpu.memory_space<vmem>>, vector<8x32xf32>
    tpu.vector_store %arg9[%c32, %c0_24], %53 {strides = array<i32>} : memref<128x32xf32, #tpu.memory_space<vmem>>, vector<8x32xf32>,
    %55 = vector.extract_strided_slice %8 {offsets = [48, 0], sizes = [8, 64], strides = [1, 1]} : vector<128x64xf32> to vector<8x64xf32>
    %cst_25 = arith.constant dense<0.000000e+00> : vector<8x64xf32>
    %56 = tpu.matmul %52, %10, %cst_25 {dimension_numbers = #tpu.dot_dimension_numbers<[1], [0], [0], [1], [0, 0, 1, 1], [], []>} : vector<8x64xf32>, vector<64x64xf32>, vector<8x64xf32> -> vector<8x64xf32>
    %57 = arith.addf %56, %55 : vector<8x64xf32>
    %58 = math.tanh %57 : vector<8x64xf32>
    %59 = vector.extract_strided_slice %58 {offsets = [0, 32], sizes = [8, 32], strides = [1, 1]} : vector<8x64xf32> to vector<8x32xf32>
    %c40 = arith.constant 40 : index
    %c0_26 = arith.constant 0 : index
    %60 = vector.load %arg9[%c40, %c0_26] : memref<128x32xf32, #tpu.memory_space<vmem>>, vector<8x32xf32>
    tpu.vector_store %arg9[%c40, %c0_26], %59 {strides = array<i32>} : memref<128x32xf32, #tpu.memory_space<vmem>>, vector<8x32xf32>,
    %61 = vector.extract_strided_slice %8 {offsets = [56, 0], sizes = [8, 64], strides = [1, 1]} : vector<128x64xf32> to vector<8x64xf32>
    %cst_27 = arith.constant dense<0.000000e+00> : vector<8x64xf32>
    %62 = tpu.matmul %58, %10, %cst_27 {dimension_numbers = #tpu.dot_dimension_numbers<[1], [0], [0], [1], [0, 0, 1, 1], [], []>} : vector<8x64xf32>, vector<64x64xf32>, vector<8x64xf32> -> vector<8x64xf32>
    %63 = arith.addf %62, %61 : vector<8x64xf32>
    %64 = math.tanh %63 : vector<8x64xf32>
    %65 = vector.extract_strided_slice %64 {offsets = [0, 32], sizes = [8, 32], strides = [1, 1]} : vector<8x64xf32> to vector<8x32xf32>
    %c48 = arith.constant 48 : index
    %c0_28 = arith.constant 0 : index
    %66 = vector.load %arg9[%c48, %c0_28] : memref<128x32xf32, #tpu.memory_space<vmem>>, vector<8x32xf32>
    tpu.vector_store %arg9[%c48, %c0_28], %65 {strides = array<i32>} : memref<128x32xf32, #tpu.memory_space<vmem>>, vector<8x32xf32>,
    %67 = vector.extract_strided_slice %8 {offsets = [64, 0], sizes = [8, 64], strides = [1, 1]} : vector<128x64xf32> to vector<8x64xf32>
    %cst_29 = arith.constant dense<0.000000e+00> : vector<8x64xf32>
    %68 = tpu.matmul %64, %10, %cst_29 {dimension_numbers = #tpu.dot_dimension_numbers<[1], [0], [0], [1], [0, 0, 1, 1], [], []>} : vector<8x64xf32>, vector<64x64xf32>, vector<8x64xf32> -> vector<8x64xf32>
    %69 = arith.addf %68, %67 : vector<8x64xf32>
    %70 = math.tanh %69 : vector<8x64xf32>
    %71 = vector.extract_strided_slice %70 {offsets = [0, 32], sizes = [8, 32], strides = [1, 1]} : vector<8x64xf32> to vector<8x32xf32>
    %c56 = arith.constant 56 : index
    %c0_30 = arith.constant 0 : index
    %72 = vector.load %arg9[%c56, %c0_30] : memref<128x32xf32, #tpu.memory_space<vmem>>, vector<8x32xf32>
    tpu.vector_store %arg9[%c56, %c0_30], %71 {strides = array<i32>} : memref<128x32xf32, #tpu.memory_space<vmem>>, vector<8x32xf32>,
    %73 = vector.extract_strided_slice %8 {offsets = [72, 0], sizes = [8, 64], strides = [1, 1]} : vector<128x64xf32> to vector<8x64xf32>
    %cst_31 = arith.constant dense<0.000000e+00> : vector<8x64xf32>
    %74 = tpu.matmul %70, %10, %cst_31 {dimension_numbers = #tpu.dot_dimension_numbers<[1], [0], [0], [1], [0, 0, 1, 1], [], []>} : vector<8x64xf32>, vector<64x64xf32>, vector<8x64xf32> -> vector<8x64xf32>
    %75 = arith.addf %74, %73 : vector<8x64xf32>
    %76 = math.tanh %75 : vector<8x64xf32>
    %77 = vector.extract_strided_slice %76 {offsets = [0, 32], sizes = [8, 32], strides = [1, 1]} : vector<8x64xf32> to vector<8x32xf32>
    %c64 = arith.constant 64 : index
    %c0_32 = arith.constant 0 : index
    %78 = vector.load %arg9[%c64, %c0_32] : memref<128x32xf32, #tpu.memory_space<vmem>>, vector<8x32xf32>
    tpu.vector_store %arg9[%c64, %c0_32], %77 {strides = array<i32>} : memref<128x32xf32, #tpu.memory_space<vmem>>, vector<8x32xf32>,
    %79 = vector.extract_strided_slice %8 {offsets = [80, 0], sizes = [8, 64], strides = [1, 1]} : vector<128x64xf32> to vector<8x64xf32>
    %cst_33 = arith.constant dense<0.000000e+00> : vector<8x64xf32>
    %80 = tpu.matmul %76, %10, %cst_33 {dimension_numbers = #tpu.dot_dimension_numbers<[1], [0], [0], [1], [0, 0, 1, 1], [], []>} : vector<8x64xf32>, vector<64x64xf32>, vector<8x64xf32> -> vector<8x64xf32>
    %81 = arith.addf %80, %79 : vector<8x64xf32>
    %82 = math.tanh %81 : vector<8x64xf32>
    %83 = vector.extract_strided_slice %82 {offsets = [0, 32], sizes = [8, 32], strides = [1, 1]} : vector<8x64xf32> to vector<8x32xf32>
    %c72 = arith.constant 72 : index
    %c0_34 = arith.constant 0 : index
    %84 = vector.load %arg9[%c72, %c0_34] : memref<128x32xf32, #tpu.memory_space<vmem>>, vector<8x32xf32>
    tpu.vector_store %arg9[%c72, %c0_34], %83 {strides = array<i32>} : memref<128x32xf32, #tpu.memory_space<vmem>>, vector<8x32xf32>,
    %85 = vector.extract_strided_slice %8 {offsets = [88, 0], sizes = [8, 64], strides = [1, 1]} : vector<128x64xf32> to vector<8x64xf32>
    %cst_35 = arith.constant dense<0.000000e+00> : vector<8x64xf32>
    %86 = tpu.matmul %82, %10, %cst_35 {dimension_numbers = #tpu.dot_dimension_numbers<[1], [0], [0], [1], [0, 0, 1, 1], [], []>} : vector<8x64xf32>, vector<64x64xf32>, vector<8x64xf32> -> vector<8x64xf32>
    %87 = arith.addf %86, %85 : vector<8x64xf32>
    %88 = math.tanh %87 : vector<8x64xf32>
    %89 = vector.extract_strided_slice %88 {offsets = [0, 32], sizes = [8, 32], strides = [1, 1]} : vector<8x64xf32> to vector<8x32xf32>
    %c80 = arith.constant 80 : index
    %c0_36 = arith.constant 0 : index
    %90 = vector.load %arg9[%c80, %c0_36] : memref<128x32xf32, #tpu.memory_space<vmem>>, vector<8x32xf32>
    tpu.vector_store %arg9[%c80, %c0_36], %89 {strides = array<i32>} : memref<128x32xf32, #tpu.memory_space<vmem>>, vector<8x32xf32>,
    %91 = vector.extract_strided_slice %8 {offsets = [96, 0], sizes = [8, 64], strides = [1, 1]} : vector<128x64xf32> to vector<8x64xf32>
    %cst_37 = arith.constant dense<0.000000e+00> : vector<8x64xf32>
    %92 = tpu.matmul %88, %10, %cst_37 {dimension_numbers = #tpu.dot_dimension_numbers<[1], [0], [0], [1], [0, 0, 1, 1], [], []>} : vector<8x64xf32>, vector<64x64xf32>, vector<8x64xf32> -> vector<8x64xf32>
    %93 = arith.addf %92, %91 : vector<8x64xf32>
    %94 = math.tanh %93 : vector<8x64xf32>
    %95 = vector.extract_strided_slice %94 {offsets = [0, 32], sizes = [8, 32], strides = [1, 1]} : vector<8x64xf32> to vector<8x32xf32>
    %c88 = arith.constant 88 : index
    %c0_38 = arith.constant 0 : index
    %96 = vector.load %arg9[%c88, %c0_38] : memref<128x32xf32, #tpu.memory_space<vmem>>, vector<8x32xf32>
    tpu.vector_store %arg9[%c88, %c0_38], %95 {strides = array<i32>} : memref<128x32xf32, #tpu.memory_space<vmem>>, vector<8x32xf32>,
    %97 = vector.extract_strided_slice %8 {offsets = [104, 0], sizes = [8, 64], strides = [1, 1]} : vector<128x64xf32> to vector<8x64xf32>
    %cst_39 = arith.constant dense<0.000000e+00> : vector<8x64xf32>
    %98 = tpu.matmul %94, %10, %cst_39 {dimension_numbers = #tpu.dot_dimension_numbers<[1], [0], [0], [1], [0, 0, 1, 1], [], []>} : vector<8x64xf32>, vector<64x64xf32>, vector<8x64xf32> -> vector<8x64xf32>
    %99 = arith.addf %98, %97 : vector<8x64xf32>
    %100 = math.tanh %99 : vector<8x64xf32>
    %101 = vector.extract_strided_slice %100 {offsets = [0, 32], sizes = [8, 32], strides = [1, 1]} : vector<8x64xf32> to vector<8x32xf32>
    %c96 = arith.constant 96 : index
    %c0_40 = arith.constant 0 : index
    %102 = vector.load %arg9[%c96, %c0_40] : memref<128x32xf32, #tpu.memory_space<vmem>>, vector<8x32xf32>
    tpu.vector_store %arg9[%c96, %c0_40], %101 {strides = array<i32>} : memref<128x32xf32, #tpu.memory_space<vmem>>, vector<8x32xf32>,
    %103 = vector.extract_strided_slice %8 {offsets = [112, 0], sizes = [8, 64], strides = [1, 1]} : vector<128x64xf32> to vector<8x64xf32>
    %cst_41 = arith.constant dense<0.000000e+00> : vector<8x64xf32>
    %104 = tpu.matmul %100, %10, %cst_41 {dimension_numbers = #tpu.dot_dimension_numbers<[1], [0], [0], [1], [0, 0, 1, 1], [], []>} : vector<8x64xf32>, vector<64x64xf32>, vector<8x64xf32> -> vector<8x64xf32>
    %105 = arith.addf %104, %103 : vector<8x64xf32>
    %106 = math.tanh %105 : vector<8x64xf32>
    %107 = vector.extract_strided_slice %106 {offsets = [0, 32], sizes = [8, 32], strides = [1, 1]} : vector<8x64xf32> to vector<8x32xf32>
    %c104 = arith.constant 104 : index
    %c0_42 = arith.constant 0 : index
    %108 = vector.load %arg9[%c104, %c0_42] : memref<128x32xf32, #tpu.memory_space<vmem>>, vector<8x32xf32>
    tpu.vector_store %arg9[%c104, %c0_42], %107 {strides = array<i32>} : memref<128x32xf32, #tpu.memory_space<vmem>>, vector<8x32xf32>,
    %109 = vector.extract_strided_slice %8 {offsets = [120, 0], sizes = [8, 64], strides = [1, 1]} : vector<128x64xf32> to vector<8x64xf32>
    %cst_43 = arith.constant dense<0.000000e+00> : vector<8x64xf32>
    %110 = tpu.matmul %106, %10, %cst_43 {dimension_numbers = #tpu.dot_dimension_numbers<[1], [0], [0], [1], [0, 0, 1, 1], [], []>} : vector<8x64xf32>, vector<64x64xf32>, vector<8x64xf32> -> vector<8x64xf32>
    %111 = arith.addf %110, %109 : vector<8x64xf32>
    %112 = math.tanh %111 : vector<8x64xf32>
    %113 = vector.extract_strided_slice %112 {offsets = [0, 32], sizes = [8, 32], strides = [1, 1]} : vector<8x64xf32> to vector<8x32xf32>
    %c112 = arith.constant 112 : index
    %c0_44 = arith.constant 0 : index
    %114 = vector.load %arg9[%c112, %c0_44] : memref<128x32xf32, #tpu.memory_space<vmem>>, vector<8x32xf32>
    tpu.vector_store %arg9[%c112, %c0_44], %113 {strides = array<i32>} : memref<128x32xf32, #tpu.memory_space<vmem>>, vector<8x32xf32>,
    %115 = tpu.iota {dimensions = array<i32: 1>} : vector<1x64xi32>
    %c32_i32_45 = arith.constant 32 : i32
    %116 = vector.broadcast %c32_i32_45 : i32 to vector<1x64xi32>
    %117 = arith.cmpi sge, %115, %116 : vector<1x64xi32>
    %c64_i32 = arith.constant 64 : i32
    %118 = vector.broadcast %c64_i32 : i32 to vector<1x64xi32>
    %119 = arith.cmpi slt, %115, %118 : vector<1x64xi32>
    %120 = arith.andi %117, %119 : vector<1x64xi1>
    %cst_46 = arith.constant dense<0.000000e+00> : vector<8x64xf32>
    %121 = tpu.matmul %112, %10, %cst_46 {dimension_numbers = #tpu.dot_dimension_numbers<[1], [0], [0], [1], [0, 0, 1, 1], [], []>} : vector<8x64xf32>, vector<64x64xf32>, vector<8x64xf32> -> vector<8x64xf32>
    %122 = vector.broadcast %9 : vector<1x64xf32> to vector<8x64xf32>
    %123 = arith.addf %121, %122 : vector<8x64xf32>
    %124 = math.tanh %123 : vector<8x64xf32>
    %125 = vector.extract_strided_slice %124 {offsets = [0, 32], sizes = [8, 32], strides = [1, 1]} : vector<8x64xf32> to vector<8x32xf32>
    %c120 = arith.constant 120 : index
    %c0_47 = arith.constant 0 : index
    %126 = vector.load %arg9[%c120, %c0_47] : memref<128x32xf32, #tpu.memory_space<vmem>>, vector<8x32xf32>
    tpu.vector_store %arg9[%c120, %c0_47], %125 {strides = array<i32>} : memref<128x32xf32, #tpu.memory_space<vmem>>, vector<8x32xf32>,
    %127 = vector.shape_cast %120 : vector<1x64xi1> to vector<1x64xi1>
    %128 = vector.broadcast %127 : vector<1x64xi1> to vector<8x64xi1>
    %129 = arith.select %128, %124, %112 : vector<8x64xi1>, vector<8x64xf32>
    %c0_48 = arith.constant 0 : index
    %c0_49 = arith.constant 0 : index
    %130 = vector.load %arg8[%c0_48, %c0_49] : memref<8x64xf32, #tpu.memory_space<vmem>>, vector<8x64xf32>
    tpu.vector_store %arg8[%c0_48, %c0_49], %129 {strides = array<i32>} : memref<8x64xf32, #tpu.memory_space<vmem>>, vector<8x64xf32>,
    %c0_50 = arith.constant 0 : index
    %c0_51 = arith.constant 0 : index
    %131 = vector.load %arg5[%c0_50, %c0_51] : memref<1x32xf32, #tpu.memory_space<vmem>>, vector<1x32xf32>
    %c0_52 = arith.constant 0 : index
    %c0_53 = arith.constant 0 : index
    %132 = vector.load %arg9[%c0_52, %c0_53] : memref<128x32xf32, #tpu.memory_space<vmem>>, vector<128x32xf32>
    %cst_54 = arith.constant dense<0.000000e+00> : vector<1x128xf32>
    %133 = tpu.matmul %131, %132, %cst_54 {dimension_numbers = #tpu.dot_dimension_numbers<[1], [1], [0], [0], [0, 0, 1, 0], [], []>} : vector<1x32xf32>, vector<128x32xf32>, vector<1x128xf32> -> vector<1x128xf32>
    %c0_55 = arith.constant 0 : index
    %c0_56 = arith.constant 0 : index
    %134 = vector.load %arg6[%c0_55, %c0_56] : memref<1x1xf32, #tpu.memory_space<vmem>>, vector<1x1xf32>
    %135 = vector.broadcast %134 : vector<1x1xf32> to vector<1x128xf32>
    %136 = arith.addf %133, %135 : vector<1x128xf32>
    %c0_57 = arith.constant 0 : index
    %c0_58 = arith.constant 0 : index
    %c0_59 = arith.constant 0 : index
    %137 = vector.load %arg7[%c0_57, %c0_58, %c0_59] : memref<1x1x128xf32, #tpu.memory_space<vmem>>, vector<1x1x128xf32>
    %138 = vector.shape_cast %137 : vector<1x1x128xf32> to vector<1x128xf32>
    %139 = vector.shape_cast %136 : vector<1x128xf32> to vector<1x1x128xf32>
    tpu.vector_store %arg7[%c0_57, %c0_58, %c0_59], %139 {strides = array<i32>} : memref<1x1x128xf32, #tpu.memory_space<vmem>>, vector<1x1x128xf32>,
    return
  }
  func.func @transform_0(%arg0: i32) -> (i32, i32) {
    %c0_i32 = arith.constant 0 : i32
    %c0_i32_0 = arith.constant 0 : i32
    return %arg0, %c0_i32 : i32, i32
  }
  func.func @transform_1(%arg0: i32) -> (i32, i32) {
    %c0_i32 = arith.constant 0 : i32
    %c0_i32_0 = arith.constant 0 : i32
    %c0_i32_1 = arith.constant 0 : i32
    return %c0_i32, %c0_i32_0 : i32, i32
  }
  func.func @transform_2(%arg0: i32) -> (i32, i32) {
    %c0_i32 = arith.constant 0 : i32
    %c0_i32_0 = arith.constant 0 : i32
    %c0_i32_1 = arith.constant 0 : i32
    return %c0_i32, %c0_i32_0 : i32, i32
  }
  func.func @transform_3(%arg0: i32) -> (i32, i32) {
    %c0_i32 = arith.constant 0 : i32
    %c0_i32_0 = arith.constant 0 : i32
    %c0_i32_1 = arith.constant 0 : i32
    return %c0_i32, %c0_i32_0 : i32, i32
  }
  func.func @transform_4(%arg0: i32) -> (i32, i32) {
    %c0_i32 = arith.constant 0 : i32
    %c0_i32_0 = arith.constant 0 : i32
    %c0_i32_1 = arith.constant 0 : i32
    return %c0_i32, %c0_i32_0 : i32, i32
  }
  func.func @transform_5(%arg0: i32) -> (i32, i32) {
    %c0_i32 = arith.constant 0 : i32
    %c0_i32_0 = arith.constant 0 : i32
    %c0_i32_1 = arith.constant 0 : i32
    return %c0_i32, %c0_i32_0 : i32, i32
  }
  func.func @transform_6(%arg0: i32) -> (i32, i32, i32) {
    %c0_i32 = arith.constant 0 : i32
    %c0_i32_0 = arith.constant 0 : i32
    %c0_i32_1 = arith.constant 0 : i32
    return %arg0, %c0_i32, %c0_i32_0 : i32, i32, i32
  }
  func.func @transform_7(%arg0: i32) -> (i32, i32) {
    %c0_i32 = arith.constant 0 : i32
    %c0_i32_0 = arith.constant 0 : i32
    %c0_i32_1 = arith.constant 0 : i32
    return %c0_i32, %c0_i32_0 : i32, i32
  }
}

</mosaic_0001>

<bundles_post_ra>
// kernel: tpu_custom_call.1
= control target key start
LH: loop header
LB: loop body
LE: loop exit
PB: predicated region body
PF: predicated region fallthrough
CT: control target
= control target key end

     0   :  { %s3170_s0 = inlined_call_operand.vmem [shape: f32[128,16], index: 0, kind: input, shape index: {}]   ;;  %s3171_s1 = inlined_call_operand.vmem [shape: f32[16,64], index: 1, kind: input, shape index: {}]   ;;  %s3172_s2 = inlined_call_operand.vmem [shape: f32[64,64], index: 2, kind: input, shape index: {}]   ;;  %s3173_s3 = inlined_call_operand.vmem [shape: f32[1,64], index: 3, kind: input, shape index: {}]   ;;  %s3174_s4 = inlined_call_operand.vmem [shape: f32[1,32], index: 4, kind: input, shape index: {}]   ;;  %s3175_s5 = inlined_call_operand.<no memory space> [shape: f32[1,1], index: 5, kind: input, shape index: {}]   ;;  %s3176_s6 = inlined_call_operand.hbm [shape: f32[1,1,128], index: 6, kind: output, shape index: {0}]   ;;  %s3177_s7 = inlined_call_operand.hbm [shape: f32[8,64], index: 7, kind: output, shape index: {1}]  }
   0x1   :  { %v13_v0 = vstv %s3175_s5 }
   0x2   :  { %14 = vst [vmem:[#allocation3] sm:$0x1] %v13_v0 }
   0x3   :  { %15 = vsyncpa [#allocation5], 0  ;;  %v52_v1 = vld [vmem:[%s3171_s1 + $0x8] sm:$0xff]  ;;  %v51_v2 = vld [vmem:[%s3171_s1] sm:$0xff]  ;;  %vm60_vm0 = vcmask 130048   ;;  %vm33_vm1 = vcmask 523264  }
   0x4   :  { %v35_v3 = vld [vmem:[%s3170_s0] sm:$0xff]  ;;  %2019 = vmatprep.subr.mxu0 %v52_v1  ;;  %v36_v4 = vld [vmem:[%s3170_s0 + $0x8] sm:$0xff]  ;;  %v2555_v5 = vld [vmem:[%s3172_s2 + $0x38] sm:$0xff]  ;;  %v2490_v6 = vmov 0.0  }
   0x5   :  { %2023 = vmatprep.mubr.msk.f32.mxu0 %vm60_vm0, %v35_v3  ;;  %2020 = vmatpush3.msra.mxu0 %v52_v1  ;;  %34 = vst.msk [vmem:[#allocation6] sm:$0xff] %vm33_vm1, %v2490_v6  ;;  %v37_v7 = vld [vmem:[%s3170_s0 + $0x10] sm:$0xff]  ;;  %v38_v9 = vld [vmem:[%s3170_s0 + $0x18] sm:$0xff]  ;;  %v39_v10 = vld [vmem:[%s3170_s0 + $0x20] sm:$0xff] }
   0x6   :  { %2104 = vmatprep.subr.mxu1 %v2490_v6  ;;  %2021 = vmatprep.subr.mxu0 %v51_v2  ;;  %v2570_v8 = vld [vmem:[%s3172_s2 + $0x30] sm:$0xff]  ;;  %v2584_v11 = vld [vmem:[%s3172_s2 + $0x28] sm:$0xff] }
   0x7   :  { %2105 = vmatpush3.msra.mxu1 %v2555_v5  ;;  %2022 = vmatpush3.msra.mxu0 %v51_v2 }
   0x8   :  { %2106 = vmatprep.subr.mxu1 %v2490_v6  ;;  %2024 = vmatmul.mubr.msk.f32.vlgmr.msra.gmra.mxu0 %vm60_vm0, %v36_v4 }
   0x9   :  { %2047 = vmatprep.subr.mxu0 %v2490_v6  ;;  %2026 = vmatprep.mubr.msk.f32.mxu0 %vm60_vm0, %v37_v7 }
   0xa   :  { %2048 = vmatpush3.msra.mxu0 %v2555_v5  ;;  %2107 = vmatpush3.msra.mxu1 %v2570_v8 }
   0xb   :  { %2049 = vmatprep.subr.mxu0 %v2490_v6  ;;  %2108 = vmatprep.subr.mxu1 %v2490_v6 }
   0xc   :  { %2050 = vmatpush3.msra.mxu0 %v2570_v8 }
   0xd   :  { %16 = vsyncpa [#allocation7], 0  ;;  %2027 = vmatmul.mubr.msk.f32.gmra.mxu0 %vm60_vm0, %v38_v9  ;;  %2051 = vmatprep.subr.mxu0 %v2490_v6  ;;  %v2594_v12 = vld [vmem:[%s3172_s2 + $0x20] sm:$0xff]  ;;  %v40_v13 = vld [vmem:[%s3170_s0 + $0x28] sm:$0xff]  ;;  %vm2491_vm2 = vmmov 0   ;;  %v263_v50 = vlaneseq  ;;  %vm424_vm4 = vcmask 261120  }
   0xe   :  { %2029 = vmatprep.mubr.msk.f32.mxu0 %vm60_vm0, %v39_v10  ;;  %2052 = vmatpush3.msra.mxu0 %v2584_v11  ;;  %v41_v14 = vld [vmem:[%s3170_s0 + $0x30] sm:$0xff]  ;;  %v2608_v15 = vld [vmem:[%s3172_s2 + $0x18] sm:$0xff]  ;;  %v43_v18 = vld [vmem:[%s3170_s0 + $0x40] sm:$0xff]  ;;  %s2494_s30 = smov [#allocation6]  }
   0xf   :  { %2053 = vmatprep.subr.mxu0 %v2490_v6  ;;  %2109 = vmatpush3.msra.mxu1 %v2584_v11  ;;  %v2618_v16 = vld [vmem:[%s3172_s2 + $0x10] sm:$0xff]  ;;  %v42_v17 = vld [vmem:[%s3170_s0 + $0x38] sm:$0xff]  ;;  %v2632_v19 = vld [vmem:[%s3172_s2 + $0x8] sm:$0xff]  ;;  %v2743_v51 = vand.u32 127, %v263_v50  ;;  %s1768_s8 = sshll.u32 %s2494_s30, 4  ;;  %s1769_s8 = int_to_ptr.vmem [resolvable:$true] %s1768_s8 }
  0x10   :  { %2054 = vmatpush3.msra.mxu0 %v2594_v12  ;;  %2110 = vmatprep.subr.mxu1 %v2490_v6  ;;  %v2642_v20 = vld [vmem:[%s3172_s2] sm:$0xff]  ;;  %v44_v21 = vld [vmem:[%s3170_s0 + $0x48] sm:$0xff]  ;;  %v45_v22 = vld [vmem:[%s3170_s0 + $0x50] sm:$0xff]  ;;  %s2446_s5 = scalar_lea.vmem %s1769_s8, 128  ;;  %p2451_p1 = scmp.lt.s32.totalorder %s1769_s8, %s1769_s8 }
  0x11   :  { %2030 = vmatmul.mubr.msk.f32.gmra.mxu0 %vm60_vm0, %v40_v13  ;;  %2055 = vmatprep.subr.mxu0 %v2490_v6  ;;  %v46_v23 = vld [vmem:[%s3170_s0 + $0x58] sm:$0xff]  ;;  %v47_v24 = vld [vmem:[%s3170_s0 + $0x60] sm:$0xff]  ;;  %v48_v25 = vld [vmem:[%s3170_s0 + $0x68] sm:$0xff]  ;;  %vm266_vm3 = vcmp.lt.s32.totalorder %v2743_v51, 32  ;;  %vm1518_vm5 = vcmp.ge.s32.totalorder %v2743_v51, 32  ;;  %vm1519_vm6 = vcmp.lt.s32.totalorder %v2743_v51, 64  ;;  %p2447_p0 = scmp.ne.s32.totalorder %s1769_s8, %s2446_s5  ;;  %p2452_p2 = scmp.lt.s32.totalorder %s2446_s5, %s2446_s5 }
  0x12   :  { %2032 = vmatprep.mubr.msk.f32.mxu0 %vm60_vm0, %v41_v14  ;;  %2056 = vmatpush3.msra.mxu0 %v2608_v15  ;;  %v49_v26 = vld [vmem:[%s3170_s0 + $0x70] sm:$0xff]  ;;  %v50_v27 = vld [vmem:[%s3170_s0 + $0x78] sm:$0xff]  ;;  %v262_v28 = vld [vmem:[#allocation6] sm:$0xff]  ;;  %v2493_v51 = vmov 0  }
  0x13   :  { %2057 = vmatprep.subr.mxu0 %v2490_v6  ;;  %2111 = vmatpush3.msra.mxu1 %v2594_v12  ;;  %v2737_v44 = vld [vmem:[%s3173_s3] ss:$0 sm:$0xff]  ;;  %s2492_s3 = smov 96   ;;  %vm1520_vm7 = vmand %vm1518_vm5, %vm1519_vm6  ;;  %p2453_p3 = por %p2452_p2, %p2451_p1 }
  0x14   :  { %2058 = vmatpush3.msra.mxu0 %v2618_v16  ;;  %2112 = vmatprep.subr.mxu1 %v2490_v6 }
  0x15   :  { %2033 = vmatmul.mubr.msk.f32.gmra.mxu0 %vm60_vm0, %v42_v17  ;;  %2059 = vmatprep.subr.mxu0 %v2490_v6  ;;  %p2454_p4 = pnand %p2453_p3, %p2447_p0 }
  0x16   :  { %2035 = vmatprep.mubr.msk.f32.mxu0 %vm60_vm0, %v43_v18  ;;  %2060 = vmatpush3.msra.mxu0 %v2632_v19 }
  0x17   :  { %2061 = vmatprep.subr.mxu0 %v2490_v6  ;;  %2113 = vmatpush3.msra.mxu1 %v2608_v15 }
  0x18   :  { %2062 = vmatpush3.msra.mxu0 %v2642_v20  ;;  %2114 = vmatprep.subr.mxu1 %v2490_v6 }
  0x19   :  { %2036 = vmatmul.mubr.msk.f32.gmra.mxu0 %vm60_vm0, %v44_v21  ;;  %2066 = vmatprep.subr.mxu0 %v2490_v6 }
  0x1a   :  { %2038 = vmatprep.mubr.msk.f32.mxu0 %vm60_vm0, %v45_v22  ;;  %2115 = vmatpush3.msra.mxu1 %v2618_v16 }
  0x1b   :  { %2116 = vmatprep.subr.mxu1 %v2490_v6  ;;  %2120 = vmatprep.mubr.msk.f32.mxu1 %vm2491_vm2, %v2490_v6 }
  0x1c   :  { %2117 = vmatpush3.msra.mxu1 %v2632_v19  ;;  %2411 = vset.pattern.permute.xlu0 %v2493_v51 }
  0x1d   :  { %2039 = vmatmul.mubr.msk.f32.gmra.mxu0 %vm60_vm0, %v46_v23  ;;  %2118 = vmatprep.subr.mxu1 %v2490_v6 }
  0x1e   :  { %2041 = vmatprep.mubr.msk.f32.mxu0 %vm60_vm0, %v47_v24  ;;  %2119 = vmatpush3.msra.mxu1 %v2642_v20 }
  0x1f   :  { %2142 = vmatprep.subr.mxu1 %v2490_v6 }
  0x21   :  { %2042 = vmatmul.mubr.msk.f32.gmra.mxu0 %vm60_vm0, %v48_v25 }
  0x22   :  { %2044 = vmatprep.mubr.msk.f32.mxu0 %vm60_vm0, %v49_v26 }
  0x25   :  { %2045 = vmatmul.mubr.msk.f32.gmra.mxu0 %vm60_vm0, %v50_v27 }
  0x26   :  { %2063 = vmatprep.mubr.msk.f32.mxu0 %vm2491_vm2, %v2490_v6 }
  0x29   :  { %2064 = vmatmul.mubr.msk.f32.vlgmr.msra.gmra.mxu0 %vm33_vm1, %v262_v28 }
  0x2a   :  { %2067 = vmatpush3.msra.mxu0 %v2555_v5  ;;  %2082 = vmatprep.mubr.msk.f32.mxu0 %vm2491_vm2, %v2490_v6 }
  0x2b   :  { %2068 = vmatprep.subr.mxu0 %v2490_v6 }
  0x2c   :  { %2069 = vmatpush3.msra.mxu0 %v2570_v8 }
  0x2d   :  { %2070 = vmatprep.subr.mxu0 %v2490_v6 }
  0x2e   :  { %2071 = vmatpush3.msra.mxu0 %v2584_v11 }
  0x2f   :  { %2072 = vmatprep.subr.mxu0 %v2490_v6 }
  0x30   :  { %2073 = vmatpush3.msra.mxu0 %v2594_v12 }
  0x31   :  { %2074 = vmatprep.subr.mxu0 %v2490_v6 }
  0x32   :  { %2075 = vmatpush3.msra.mxu0 %v2608_v15 }
  0x33   :  { %2076 = vmatprep.subr.mxu0 %v2490_v6 }
  0x34   :  { %2077 = vmatpush3.msra.mxu0 %v2618_v16 }
  0x35   :  { %2078 = vmatprep.subr.mxu0 %v2490_v6 }
  0x36   :  { %2079 = vmatpush3.msra.mxu0 %v2632_v19 }
  0x37   :  { %2080 = vmatprep.subr.mxu0 %v2490_v6 }
  0x38   :  { %2081 = vmatpush3.msra.mxu0 %v2642_v20 }
  0x39   :  { %2085 = vmatprep.subr.mxu0 %v2490_v6 }
  0xc8   :  { %v2025_v29 = vpop.f32.mrf.mxu0 }
  0xc9   :  { %v181_v54 = vadd.f32 %v2025_v29, %v2737_v44 }
  0xca   :  { %v175_v30 = vpop.f32.mrf.mxu0 }
  0xcb   :  { %v176_v46 = vadd.f32 %v2737_v44, %v175_v30 }
  0xcd   :  { %v2708_v31 = vpop.f32.mrf.mxu0 }
  0xce   :  { %v191_v0 = vadd.f32 %v2708_v31, %v2737_v44 }
  0xcf   :  { %v2710_v32 = vpop.f32.mrf.mxu0 }
  0xd0   :  { %v186_v59 = vadd.f32 %v2737_v44, %v2710_v32 }
  0xd1   :  { %v2712_v33 = vpop.f32.mrf.mxu0 }
  0xd2   :  { %v201_v17 = vadd.f32 %v2712_v33, %v2737_v44 }
  0xd3   :  { %v2714_v34 = vpop.f32.mrf.mxu0 }
  0xd4   :  { %v196_v7 = vadd.f32 %v2737_v44, %v2714_v34 }
  0xd5   :  { %v2716_v35 = vpop.f32.mrf.mxu0 }
  0xd6   :  { %v211_v29 = vadd.f32 %v2716_v35, %v2737_v44 }
  0xd7   :  { %v2718_v36 = vpop.f32.mrf.mxu0 }
  0xd8   :  { %v206_v24 = vadd.f32 %v2737_v44, %v2718_v36 }
  0xd9   :  { %v2720_v37 = vpop.f32.mrf.mxu0 }
  0xdb   :  { %v2722_v38 = vpop.f32.mrf.mxu0 }
  0xdc   :  { %v216_v34 = vadd.f32 %v2737_v44, %v2722_v38  ;;  %v221_v38 = vadd.f32 %v2720_v37, %v2737_v44 }
  0xdd   :  { %v2724_v39 = vpop.f32.mrf.mxu0 }
  0xdf   :  { %v2726_v40 = vpop.f32.mrf.mxu0 }
  0xe0   :  { %v226_v37 = vadd.f32 %v2737_v44, %v2726_v40  ;;  %v231_v40 = vadd.f32 %v2724_v39, %v2737_v44 }
  0xe1   :  { %v2728_v41 = vpop.f32.mrf.mxu0 }
  0xe3   :  { %v2730_v42 = vpop.f32.mrf.mxu0 }
  0xe4   :  { %v236_v39 = vadd.f32 %v2737_v44, %v2730_v42  ;;  %v241_v42 = vadd.f32 %v2728_v41, %v2737_v44 }
  0xe5   :  { %v2732_v43 = vpop.f32.mrf.mxu0 }
  0xe7   :  { %v2739_v45 = vpop.f32.mrf.mxu0 }
  0xe9   :  { %v338_v47 = vpop.f32.mrf.mxu0 }
  0xea   :  { %v339_v48 = vadd.f32 %v338_v47, %v176_v46 }
  0xeb   :  { %v2065_v49 = vpop.f32.mrf.mxu0 }
  0xec   :  { %2412 = vtanh.f32 %v339_v48 }
  0xf9   :  { %v2413_v52 = vpop.eup %2412 }
  0xfa   :  { %v345_v53 = vsel %vm266_vm3, %v2413_v52, %v262_v28 }
  0xfb   :  { %2083 = vmatmul.mubr.msk.f32.vlgmr.msra.gmra.mxu0 %vm33_vm1, %v345_v53 }
  0xfc   :  { %2086 = vmatpush3.msra.mxu0 %v2555_v5  ;;  %2101 = vmatprep.mubr.msk.f32.mxu0 %vm2491_vm2, %v2490_v6 }
  0xfd   :  { %2087 = vmatprep.subr.mxu0 %v2490_v6 }
  0xfe   :  { %2088 = vmatpush3.msra.mxu0 %v2570_v8 }
  0xff   :  { %2089 = vmatprep.subr.mxu0 %v2490_v6 }
 0x100   :  { %2090 = vmatpush3.msra.mxu0 %v2584_v11 }
 0x101   :  { %2091 = vmatprep.subr.mxu0 %v2490_v6 }
 0x102   :  { %2092 = vmatpush3.msra.mxu0 %v2594_v12 }
 0x103   :  { %2093 = vmatprep.subr.mxu0 %v2490_v6 }
 0x104   :  { %2094 = vmatpush3.msra.mxu0 %v2608_v15 }
 0x105   :  { %2095 = vmatprep.subr.mxu0 %v2490_v6 }
 0x106   :  { %2096 = vmatpush3.msra.mxu0 %v2618_v16 }
 0x107   :  { %2097 = vmatprep.subr.mxu0 %v2490_v6 }
 0x108   :  { %2098 = vmatpush3.msra.mxu0 %v2632_v19 }
 0x109   :  { %2099 = vmatprep.subr.mxu0 %v2490_v6 }
 0x10a   :  { %2100 = vmatpush3.msra.mxu0 %v2642_v20 }
 0x10b   :  { %2123 = vmatprep.subr.mxu0 %v2490_v6 }
 0x1bb   :  { %v415_v55 = vpop.f32.mrf.mxu0 }
 0x1bc   :  { %v416_v56 = vadd.f32 %v415_v55, %v181_v54 }
 0x1bd   :  { %v2084_v57 = vpop.f32.mrf.mxu0 }
 0x1be   :  { %2414 = vtanh.f32 %v416_v56 }
 0x1cb   :  { %v2766_v58 = vpop.eup %2414 }
 0x1cc   :  { %2102 = vmatmul.mubr.msk.f32.vlgmr.msra.gmra.mxu0 %vm33_vm1, %v2766_v58 }
 0x1cd   :  { %2124 = vmatpush3.msra.mxu0 %v2555_v5  ;;  %2139 = vmatprep.mubr.msk.f32.mxu0 %vm2491_vm2, %v2490_v6 }
 0x1ce   :  { %2125 = vmatprep.subr.mxu0 %v2490_v6 }
 0x1cf   :  { %2126 = vmatpush3.msra.mxu0 %v2570_v8 }
 0x1d0   :  { %2127 = vmatprep.subr.mxu0 %v2490_v6 }
 0x1d1   :  { %2128 = vmatpush3.msra.mxu0 %v2584_v11 }
 0x1d2   :  { %2129 = vmatprep.subr.mxu0 %v2490_v6 }
 0x1d3   :  { %2130 = vmatpush3.msra.mxu0 %v2594_v12 }
 0x1d4   :  { %2131 = vmatprep.subr.mxu0 %v2490_v6 }
 0x1d5   :  { %2132 = vmatpush3.msra.mxu0 %v2608_v15 }
 0x1d6   :  { %2133 = vmatprep.subr.mxu0 %v2490_v6 }
 0x1d7   :  { %2134 = vmatpush3.msra.mxu0 %v2618_v16 }
 0x1d8   :  { %2135 = vmatprep.subr.mxu0 %v2490_v6 }
 0x1d9   :  { %2136 = vmatpush3.msra.mxu0 %v2632_v19 }
 0x1da   :  { %2137 = vmatprep.subr.mxu0 %v2490_v6 }
 0x1db   :  { %2138 = vmatpush3.msra.mxu0 %v2642_v20 }
 0x1dc   :  { %2161 = vmatprep.subr.mxu0 %v2490_v6 }
 0x28c   :  { %v494_v60 = vpop.f32.mrf.mxu0 }
 0x28d   :  { %v495_v61 = vadd.f32 %v494_v60, %v186_v59 }
 0x28e   :  { %v2103_v62 = vpop.f32.mrf.mxu0 }
 0x28f   :  { %2416 = vtanh.f32 %v495_v61 }
 0x29c   :  { %v2790_v63 = vpop.eup %2416 }
 0x29d   :  { %2121 = vmatmul.mubr.msk.f32.vlgmr.msra.gmra.mxu1 %vm33_vm1, %v2790_v63 }
 0x29e   :  { %2143 = vmatpush3.msra.mxu1 %v2555_v5  ;;  %2158 = vmatprep.mubr.msk.f32.mxu1 %vm2491_vm2, %v2490_v6 }
 0x29f   :  { %2144 = vmatprep.subr.mxu1 %v2490_v6 }
 0x2a0   :  { %2145 = vmatpush3.msra.mxu1 %v2570_v8 }
 0x2a1   :  { %2146 = vmatprep.subr.mxu1 %v2490_v6 }
 0x2a2   :  { %2147 = vmatpush3.msra.mxu1 %v2584_v11 }
 0x2a3   :  { %2148 = vmatprep.subr.mxu1 %v2490_v6 }
 0x2a4   :  { %2149 = vmatpush3.msra.mxu1 %v2594_v12 }
 0x2a5   :  { %2150 = vmatprep.subr.mxu1 %v2490_v6 }
 0x2a6   :  { %2151 = vmatpush3.msra.mxu1 %v2608_v15 }
 0x2a7   :  { %2152 = vmatprep.subr.mxu1 %v2490_v6 }
 0x2a8   :  { %2153 = vmatpush3.msra.mxu1 %v2618_v16 }
 0x2a9   :  { %2154 = vmatprep.subr.mxu1 %v2490_v6 }
 0x2aa   :  { %2155 = vmatpush3.msra.mxu1 %v2632_v19 }
 0x2ab   :  { %2156 = vmatprep.subr.mxu1 %v2490_v6 }
 0x2ac   :  { %2157 = vmatpush3.msra.mxu1 %v2642_v20 }
 0x2ad   :  { %2180 = vmatprep.subr.mxu1 %v2490_v6 }
 0x35d   :  { %v572_v1 = vpop.f32.mrf.mxu1 }
 0x35e   :  { %v573_v2 = vadd.f32 %v572_v1, %v191_v0 }
 0x35f   :  { %v2122_v3 = vpop.f32.mrf.mxu1 }
 0x360   :  { %2418 = vtanh.f32 %v573_v2 }
 0x36d   :  { %v2814_v4 = vpop.eup %2418 }
 0x36e   :  { %2140 = vmatmul.mubr.msk.f32.vlgmr.msra.gmra.mxu0 %vm33_vm1, %v2814_v4 }
 0x36f   :  { %2162 = vmatpush3.msra.mxu0 %v2555_v5  ;;  %2177 = vmatprep.mubr.msk.f32.mxu0 %vm2491_vm2, %v2490_v6 }
 0x370   :  { %2163 = vmatprep.subr.mxu0 %v2490_v6 }
 0x371   :  { %2164 = vmatpush3.msra.mxu0 %v2570_v8 }
 0x372   :  { %2165 = vmatprep.subr.mxu0 %v2490_v6 }
 0x373   :  { %2166 = vmatpush3.msra.mxu0 %v2584_v11 }
 0x374   :  { %2167 = vmatprep.subr.mxu0 %v2490_v6 }
 0x375   :  { %2168 = vmatpush3.msra.mxu0 %v2594_v12 }
 0x376   :  { %2169 = vmatprep.subr.mxu0 %v2490_v6 }
 0x377   :  { %2170 = vmatpush3.msra.mxu0 %v2608_v15 }
 0x378   :  { %2171 = vmatprep.subr.mxu0 %v2490_v6 }
 0x379   :  { %2172 = vmatpush3.msra.mxu0 %v2618_v16 }
 0x37a   :  { %2173 = vmatprep.subr.mxu0 %v2490_v6 }
 0x37b   :  { %2174 = vmatpush3.msra.mxu0 %v2632_v19 }
 0x37c   :  { %2175 = vmatprep.subr.mxu0 %v2490_v6 }
 0x37d   :  { %2176 = vmatpush3.msra.mxu0 %v2642_v20 }
 0x37e   :  { %2199 = vmatprep.subr.mxu0 %v2490_v6 }
 0x42e   :  { %v650_v9 = vpop.f32.mrf.mxu0 }
 0x42f   :  { %v651_v10 = vadd.f32 %v650_v9, %v196_v7 }
 0x430   :  { %v2141_v13 = vpop.f32.mrf.mxu0 }
 0x431   :  { %2420 = vtanh.f32 %v651_v10 }
 0x43e   :  { %v2838_v14 = vpop.eup %2420 }
 0x43f   :  { %2159 = vmatmul.mubr.msk.f32.vlgmr.msra.gmra.mxu1 %vm33_vm1, %v2838_v14 }
 0x440   :  { %2181 = vmatpush3.msra.mxu1 %v2555_v5  ;;  %2196 = vmatprep.mubr.msk.f32.mxu1 %vm2491_vm2, %v2490_v6 }
 0x441   :  { %2182 = vmatprep.subr.mxu1 %v2490_v6 }
 0x442   :  { %2183 = vmatpush3.msra.mxu1 %v2570_v8 }
 0x443   :  { %2184 = vmatprep.subr.mxu1 %v2490_v6 }
 0x444   :  { %2185 = vmatpush3.msra.mxu1 %v2584_v11 }
 0x445   :  { %2186 = vmatprep.subr.mxu1 %v2490_v6 }
 0x446   :  { %2187 = vmatpush3.msra.mxu1 %v2594_v12 }
 0x447   :  { %2188 = vmatprep.subr.mxu1 %v2490_v6 }
 0x448   :  { %2189 = vmatpush3.msra.mxu1 %v2608_v15 }
 0x449   :  { %2190 = vmatprep.subr.mxu1 %v2490_v6 }
 0x44a   :  { %2191 = vmatpush3.msra.mxu1 %v2618_v16 }
 0x44b   :  { %2192 = vmatprep.subr.mxu1 %v2490_v6 }
 0x44c   :  { %2193 = vmatpush3.msra.mxu1 %v2632_v19 }
 0x44d   :  { %2194 = vmatprep.subr.mxu1 %v2490_v6 }
 0x44e   :  { %2195 = vmatpush3.msra.mxu1 %v2642_v20 }
 0x44f   :  { %2218 = vmatprep.subr.mxu1 %v2490_v6 }
 0x4ff   :  { %v728_v18 = vpop.f32.mrf.mxu1 }
 0x500   :  { %v729_v21 = vadd.f32 %v728_v18, %v201_v17  ;;  %v251_v18 = vadd.f32 %v2732_v43, %v2737_v44 }
 0x501   :  { %v2160_v22 = vpop.f32.mrf.mxu1 }
 0x502   :  { %2422 = vtanh.f32 %v729_v21 }
 0x50f   :  { %v2862_v23 = vpop.eup %2422 }
 0x510   :  { %2178 = vmatmul.mubr.msk.f32.vlgmr.msra.gmra.mxu0 %vm33_vm1, %v2862_v23 }
 0x511   :  { %2200 = vmatpush3.msra.mxu0 %v2555_v5  ;;  %2215 = vmatprep.mubr.msk.f32.mxu0 %vm2491_vm2, %v2490_v6 }
 0x512   :  { %2201 = vmatprep.subr.mxu0 %v2490_v6 }
 0x513   :  { %2202 = vmatpush3.msra.mxu0 %v2570_v8 }
 0x514   :  { %2203 = vmatprep.subr.mxu0 %v2490_v6 }
 0x515   :  { %2204 = vmatpush3.msra.mxu0 %v2584_v11 }
 0x516   :  { %2205 = vmatprep.subr.mxu0 %v2490_v6 }
 0x517   :  { %2206 = vmatpush3.msra.mxu0 %v2594_v12 }
 0x518   :  { %2207 = vmatprep.subr.mxu0 %v2490_v6 }
 0x519   :  { %2208 = vmatpush3.msra.mxu0 %v2608_v15 }
 0x51a   :  { %2209 = vmatprep.subr.mxu0 %v2490_v6 }
 0x51b   :  { %2210 = vmatpush3.msra.mxu0 %v2618_v16 }
 0x51c   :  { %2211 = vmatprep.subr.mxu0 %v2490_v6 }
 0x51d   :  { %2212 = vmatpush3.msra.mxu0 %v2632_v19 }
 0x51e   :  { %2213 = vmatprep.subr.mxu0 %v2490_v6 }
 0x51f   :  { %2214 = vmatpush3.msra.mxu0 %v2642_v20 }
 0x520   :  { %2237 = vmatprep.subr.mxu0 %v2490_v6 }
 0x5d0   :  { %v806_v25 = vpop.f32.mrf.mxu0 }
 0x5d1   :  { %v807_v26 = vadd.f32 %v806_v25, %v206_v24 }
 0x5d2   :  { %v2179_v27 = vpop.f32.mrf.mxu0 }
 0x5d3   :  { %2424 = vtanh.f32 %v807_v26 }
 0x5e0   :  { %v2886_v28 = vpop.eup %2424 }
 0x5e1   :  { %2197 = vmatmul.mubr.msk.f32.vlgmr.msra.gmra.mxu1 %vm33_vm1, %v2886_v28 }
 0x5e2   :  { %2219 = vmatpush3.msra.mxu1 %v2555_v5  ;;  %2234 = vmatprep.mubr.msk.f32.mxu1 %vm2491_vm2, %v2490_v6 }
 0x5e3   :  { %2220 = vmatprep.subr.mxu1 %v2490_v6 }
 0x5e4   :  { %2221 = vmatpush3.msra.mxu1 %v2570_v8 }
 0x5e5   :  { %2222 = vmatprep.subr.mxu1 %v2490_v6 }
 0x5e6   :  { %2223 = vmatpush3.msra.mxu1 %v2584_v11 }
 0x5e7   :  { %2224 = vmatprep.subr.mxu1 %v2490_v6 }
 0x5e8   :  { %2225 = vmatpush3.msra.mxu1 %v2594_v12 }
 0x5e9   :  { %2226 = vmatprep.subr.mxu1 %v2490_v6 }
 0x5ea   :  { %2227 = vmatpush3.msra.mxu1 %v2608_v15 }
 0x5eb   :  { %2228 = vmatprep.subr.mxu1 %v2490_v6 }
 0x5ec   :  { %2229 = vmatpush3.msra.mxu1 %v2618_v16 }
 0x5ed   :  { %2230 = vmatprep.subr.mxu1 %v2490_v6 }
 0x5ee   :  { %2231 = vmatpush3.msra.mxu1 %v2632_v19 }
 0x5ef   :  { %2232 = vmatprep.subr.mxu1 %v2490_v6 }
 0x5f0   :  { %2233 = vmatpush3.msra.mxu1 %v2642_v20 }
 0x5f1   :  { %2256 = vmatprep.subr.mxu1 %v2490_v6 }
 0x6a1   :  { %v884_v30 = vpop.f32.mrf.mxu1 }
 0x6a2   :  { %v885_v31 = vadd.f32 %v884_v30, %v211_v29 }
 0x6a3   :  { %v2198_v32 = vpop.f32.mrf.mxu1 }
 0x6a4   :  { %2426 = vtanh.f32 %v885_v31 }
 0x6b1   :  { %v2910_v33 = vpop.eup %2426 }
 0x6b2   :  { %2216 = vmatmul.mubr.msk.f32.vlgmr.msra.gmra.mxu0 %vm33_vm1, %v2910_v33 }
 0x6b3   :  { %2238 = vmatpush3.msra.mxu0 %v2555_v5  ;;  %2253 = vmatprep.mubr.msk.f32.mxu0 %vm2491_vm2, %v2490_v6 }
 0x6b4   :  { %2239 = vmatprep.subr.mxu0 %v2490_v6 }
 0x6b5   :  { %2240 = vmatpush3.msra.mxu0 %v2570_v8 }
 0x6b6   :  { %2241 = vmatprep.subr.mxu0 %v2490_v6 }
 0x6b7   :  { %2242 = vmatpush3.msra.mxu0 %v2584_v11 }
 0x6b8   :  { %2243 = vmatprep.subr.mxu0 %v2490_v6 }
 0x6b9   :  { %2244 = vmatpush3.msra.mxu0 %v2594_v12 }
 0x6ba   :  { %2245 = vmatprep.subr.mxu0 %v2490_v6 }
 0x6bb   :  { %2246 = vmatpush3.msra.mxu0 %v2608_v15 }
 0x6bc   :  { %2247 = vmatprep.subr.mxu0 %v2490_v6 }
 0x6bd   :  { %2248 = vmatpush3.msra.mxu0 %v2618_v16 }
 0x6be   :  { %2249 = vmatprep.subr.mxu0 %v2490_v6 }
 0x6bf   :  { %2250 = vmatpush3.msra.mxu0 %v2632_v19 }
 0x6c0   :  { %2251 = vmatprep.subr.mxu0 %v2490_v6 }
 0x6c1   :  { %2252 = vmatpush3.msra.mxu0 %v2642_v20 }
 0x6c2   :  { %2275 = vmatprep.subr.mxu0 %v2490_v6 }
 0x772   :  { %v962_v35 = vpop.f32.mrf.mxu0 }
 0x773   :  { %v963_v36 = vadd.f32 %v962_v35, %v216_v34 }
 0x774   :  { %v2217_v46 = vpop.f32.mrf.mxu0 }
 0x775   :  { %2428 = vtanh.f32 %v963_v36 }
 0x782   :  { %v2934_v47 = vpop.eup %2428 }
 0x783   :  { %2235 = vmatmul.mubr.msk.f32.vlgmr.msra.gmra.mxu1 %vm33_vm1, %v2934_v47 }
 0x784   :  { %2257 = vmatpush3.msra.mxu1 %v2555_v5  ;;  %2272 = vmatprep.mubr.msk.f32.mxu1 %vm2491_vm2, %v2490_v6 }
 0x785   :  { %2258 = vmatprep.subr.mxu1 %v2490_v6 }
 0x786   :  { %2259 = vmatpush3.msra.mxu1 %v2570_v8 }
 0x787   :  { %2260 = vmatprep.subr.mxu1 %v2490_v6 }
 0x788   :  { %2261 = vmatpush3.msra.mxu1 %v2584_v11 }
 0x789   :  { %2262 = vmatprep.subr.mxu1 %v2490_v6 }
 0x78a   :  { %2263 = vmatpush3.msra.mxu1 %v2594_v12 }
 0x78b   :  { %2264 = vmatprep.subr.mxu1 %v2490_v6 }
 0x78c   :  { %2265 = vmatpush3.msra.mxu1 %v2608_v15 }
 0x78d   :  { %2266 = vmatprep.subr.mxu1 %v2490_v6 }
 0x78e   :  { %2267 = vmatpush3.msra.mxu1 %v2618_v16 }
 0x78f   :  { %2268 = vmatprep.subr.mxu1 %v2490_v6 }
 0x790   :  { %2269 = vmatpush3.msra.mxu1 %v2632_v19 }
 0x791   :  { %2270 = vmatprep.subr.mxu1 %v2490_v6 }
 0x792   :  { %2271 = vmatpush3.msra.mxu1 %v2642_v20 }
 0x793   :  { %2294 = vmatprep.subr.mxu1 %v2490_v6 }
 0x843   :  { %v1040_v48 = vpop.f32.mrf.mxu1 }
 0x844   :  { %v1041_v49 = vadd.f32 %v1040_v48, %v221_v38 }
 0x845   :  { %v2236_v52 = vpop.f32.mrf.mxu1 }
 0x846   :  { %2430 = vtanh.f32 %v1041_v49 }
 0x853   :  { %v2958_v53 = vpop.eup %2430 }
 0x854   :  { %2254 = vmatmul.mubr.msk.f32.vlgmr.msra.gmra.mxu0 %vm33_vm1, %v2958_v53 }
 0x855   :  { %2276 = vmatpush3.msra.mxu0 %v2555_v5  ;;  %2291 = vmatprep.mubr.msk.f32.mxu0 %vm2491_vm2, %v2490_v6 }
 0x856   :  { %2277 = vmatprep.subr.mxu0 %v2490_v6 }
 0x857   :  { %2278 = vmatpush3.msra.mxu0 %v2570_v8 }
 0x858   :  { %2279 = vmatprep.subr.mxu0 %v2490_v6 }
 0x859   :  { %2280 = vmatpush3.msra.mxu0 %v2584_v11 }
 0x85a   :  { %2281 = vmatprep.subr.mxu0 %v2490_v6 }
 0x85b   :  { %2282 = vmatpush3.msra.mxu0 %v2594_v12 }
 0x85c   :  { %2283 = vmatprep.subr.mxu0 %v2490_v6 }
 0x85d   :  { %2284 = vmatpush3.msra.mxu0 %v2608_v15 }
 0x85e   :  { %2285 = vmatprep.subr.mxu0 %v2490_v6 }
 0x85f   :  { %2286 = vmatpush3.msra.mxu0 %v2618_v16 }
 0x860   :  { %2287 = vmatprep.subr.mxu0 %v2490_v6 }
 0x861   :  { %2288 = vmatpush3.msra.mxu0 %v2632_v19 }
 0x862   :  { %2289 = vmatprep.subr.mxu0 %v2490_v6 }
 0x863   :  { %2290 = vmatpush3.msra.mxu0 %v2642_v20 }
 0x864   :  { %2313 = vmatprep.subr.mxu0 %v2490_v6 }
 0x914   :  { %v1118_v54 = vpop.f32.mrf.mxu0 }
 0x915   :  { %v1119_v55 = vadd.f32 %v1118_v54, %v226_v37 }
 0x916   :  { %v2255_v56 = vpop.f32.mrf.mxu0 }
 0x917   :  { %2432 = vtanh.f32 %v1119_v55 }
 0x924   :  { %v2982_v57 = vpop.eup %2432 }
 0x925   :  { %2273 = vmatmul.mubr.msk.f32.vlgmr.msra.gmra.mxu1 %vm33_vm1, %v2982_v57 }
 0x926   :  { %2295 = vmatpush3.msra.mxu1 %v2555_v5  ;;  %2310 = vmatprep.mubr.msk.f32.mxu1 %vm2491_vm2, %v2490_v6 }
 0x927   :  { %2296 = vmatprep.subr.mxu1 %v2490_v6 }
 0x928   :  { %2297 = vmatpush3.msra.mxu1 %v2570_v8 }
 0x929   :  { %2298 = vmatprep.subr.mxu1 %v2490_v6 }
 0x92a   :  { %2299 = vmatpush3.msra.mxu1 %v2584_v11 }
 0x92b   :  { %2300 = vmatprep.subr.mxu1 %v2490_v6 }
 0x92c   :  { %2301 = vmatpush3.msra.mxu1 %v2594_v12 }
 0x92d   :  { %2302 = vmatprep.subr.mxu1 %v2490_v6 }
 0x92e   :  { %2303 = vmatpush3.msra.mxu1 %v2608_v15 }
 0x92f   :  { %2304 = vmatprep.subr.mxu1 %v2490_v6 }
 0x930   :  { %2305 = vmatpush3.msra.mxu1 %v2618_v16 }
 0x931   :  { %2306 = vmatprep.subr.mxu1 %v2490_v6 }
 0x932   :  { %2307 = vmatpush3.msra.mxu1 %v2632_v19 }
 0x933   :  { %2308 = vmatprep.subr.mxu1 %v2490_v6 }
 0x934   :  { %2309 = vmatpush3.msra.mxu1 %v2642_v20 }
 0x935   :  { %2332 = vmatprep.subr.mxu1 %v2490_v6 }
 0x9e5   :  { %v1196_v59 = vpop.f32.mrf.mxu1 }
 0x9e6   :  { %v1197_v60 = vadd.f32 %v1196_v59, %v231_v40 }
 0x9e7   :  { %v2274_v61 = vpop.f32.mrf.mxu1 }
 0x9e8   :  { %2434 = vtanh.f32 %v1197_v60  ;;  %v1603_v60 = vld [vmem:[%s3174_s4] sm:$0x1] }
 0x9f5   :  { %v3006_v62 = vpop.eup %2434 }
 0x9f6   :  { %2292 = vmatmul.mubr.msk.f32.vlgmr.msra.gmra.mxu0 %vm33_vm1, %v3006_v62 }
 0x9f7   :  { %2314 = vmatpush3.msra.mxu0 %v2555_v5  ;;  %2329 = vmatprep.mubr.msk.f32.mxu0 %vm2491_vm2, %v2490_v6 }
 0x9f8   :  { %2315 = vmatprep.subr.mxu0 %v2490_v6 }
 0x9f9   :  { %2316 = vmatpush3.msra.mxu0 %v2570_v8 }
 0x9fa   :  { %2317 = vmatprep.subr.mxu0 %v2490_v6 }
 0x9fb   :  { %2318 = vmatpush3.msra.mxu0 %v2584_v11 }
 0x9fc   :  { %2319 = vmatprep.subr.mxu0 %v2490_v6 }
 0x9fd   :  { %2320 = vmatpush3.msra.mxu0 %v2594_v12 }
 0x9fe   :  { %2321 = vmatprep.subr.mxu0 %v2490_v6 }
 0x9ff   :  { %2322 = vmatpush3.msra.mxu0 %v2608_v15 }
 0xa00   :  { %2323 = vmatprep.subr.mxu0 %v2490_v6 }
 0xa01   :  { %2324 = vmatpush3.msra.mxu0 %v2618_v16 }
 0xa02   :  { %2325 = vmatprep.subr.mxu0 %v2490_v6 }
 0xa03   :  { %2326 = vmatpush3.msra.mxu0 %v2632_v19 }
 0xa04   :  { %2327 = vmatprep.subr.mxu0 %v2490_v6 }
 0xa05   :  { %2328 = vmatpush3.msra.mxu0 %v2642_v20 }
 0xa06   :  { %2351 = vmatprep.subr.mxu0 %v2490_v6 }
 0xab6   :  { %v1274_v0 = vpop.f32.mrf.mxu0 }
 0xab7   :  { %v1275_v1 = vadd.f32 %v1274_v0, %v236_v39 }
 0xab8   :  { %v2293_v2 = vpop.f32.mrf.mxu0 }
 0xab9   :  { %2436 = vtanh.f32 %v1275_v1 }
 0xac6   :  { %v3030_v3 = vpop.eup %2436 }
 0xac7   :  { %2311 = vmatmul.mubr.msk.f32.vlgmr.msra.gmra.mxu1 %vm33_vm1, %v3030_v3 }
 0xac8   :  { %2333 = vmatpush3.msra.mxu1 %v2555_v5  ;;  %2348 = vmatprep.mubr.msk.f32.mxu1 %vm2491_vm2, %v2490_v6 }
 0xac9   :  { %2334 = vmatprep.subr.mxu1 %v2490_v6 }
 0xaca   :  { %2335 = vmatpush3.msra.mxu1 %v2570_v8 }
 0xacb   :  { %2336 = vmatprep.subr.mxu1 %v2490_v6 }
 0xacc   :  { %2337 = vmatpush3.msra.mxu1 %v2584_v11 }
 0xacd   :  { %2338 = vmatprep.subr.mxu1 %v2490_v6 }
 0xace   :  { %2339 = vmatpush3.msra.mxu1 %v2594_v12 }
 0xacf   :  { %2340 = vmatprep.subr.mxu1 %v2490_v6 }
 0xad0   :  { %2341 = vmatpush3.msra.mxu1 %v2608_v15 }
 0xad1   :  { %2342 = vmatprep.subr.mxu1 %v2490_v6 }
 0xad2   :  { %2343 = vmatpush3.msra.mxu1 %v2618_v16 }
 0xad3   :  { %2344 = vmatprep.subr.mxu1 %v2490_v6 }
 0xad4   :  { %2345 = vmatpush3.msra.mxu1 %v2632_v19 }
 0xad5   :  { %2346 = vmatprep.subr.mxu1 %v2490_v6 }
 0xad6   :  { %2347 = vmatpush3.msra.mxu1 %v2642_v20 }
 0xad7   :  { %2370 = vmatprep.subr.mxu1 %v2490_v6 }
 0xb87   :  { %v1352_v7 = vpop.f32.mrf.mxu1 }
 0xb88   :  { %v1353_v9 = vadd.f32 %v1352_v7, %v241_v42 }
 0xb89   :  { %v2312_v10 = vpop.f32.mrf.mxu1 }
 0xb8a   :  { %2438 = vtanh.f32 %v1353_v9 }
 0xb97   :  { %v2439_v13 = vpop.eup %2438 }
 0xb98   :  { %2330 = vmatmul.mubr.msk.f32.vlgmr.msra.gmra.mxu0 %vm33_vm1, %v2439_v13 }
 0xb99   :  { %2352 = vmatpush3.msra.mxu0 %v2555_v5  ;;  %2367 = vmatprep.mubr.msk.f32.mxu0 %vm2491_vm2, %v2490_v6  ;;  %v246_v5 = vadd.f32 %v2737_v44, %v2739_v45 }
 0xb9a   :  { %2353 = vmatprep.subr.mxu0 %v2490_v6 }
 0xb9b   :  { %2354 = vmatpush3.msra.mxu0 %v2570_v8 }
 0xb9c   :  { %2355 = vmatprep.subr.mxu0 %v2490_v6 }
 0xb9d   :  { %2356 = vmatpush3.msra.mxu0 %v2584_v11 }
 0xb9e   :  { %2357 = vmatprep.subr.mxu0 %v2490_v6 }
 0xb9f   :  { %2358 = vmatpush3.msra.mxu0 %v2594_v12 }
 0xba0   :  { %2359 = vmatprep.subr.mxu0 %v2490_v6 }
 0xba1   :  { %2360 = vmatpush3.msra.mxu0 %v2608_v15 }
 0xba2   :  { %2361 = vmatprep.subr.mxu0 %v2490_v6 }
 0xba3   :  { %2362 = vmatpush3.msra.mxu0 %v2618_v16 }
 0xba4   :  { %2363 = vmatprep.subr.mxu0 %v2490_v6 }
 0xba5   :  { %2364 = vmatpush3.msra.mxu0 %v2632_v19 }
 0xba6   :  { %2365 = vmatprep.subr.mxu0 %v2490_v6 }
 0xba7   :  { %2366 = vmatpush3.msra.mxu0 %v2642_v20 }
 0xc58   :  { %v1430_v8 = vpop.f32.mrf.mxu0 }
 0xc59   :  { %v1431_v11 = vadd.f32 %v1430_v8, %v246_v5 }
 0xc5a   :  { %v2331_v12 = vpop.f32.mrf.mxu0 }
 0xc5b   :  { %2440 = vtanh.f32 %v1431_v11 }
 0xc68   :  { %v2441_v15 = vpop.eup %2440 }
 0xc69   :  { %1436 = vrot.lane.b32.xlu1 %v2441_v15, %s2492_s3  ;;  %2349 = vmatmul.mubr.msk.f32.vlgmr.msra.gmra.mxu1 %vm33_vm1, %v2441_v15 }
 0xc6a   :  { %2402 = vmatprep.mubr.msk.f32.mxu1 %vm2491_vm2, %v2490_v6 }
 0xc6d   :  { %1358 = vrot.lane.b32.xlu1 %v2439_v13, %s2492_s3 }
 0xc71   :  { %1202 = vrot.lane.b32.xlu1 %v3006_v62, %s2492_s3 }
 0xc75   :  { %1046 = vrot.lane.b32.xlu1 %v2958_v53, %s2492_s3 }
 0xc79   :  { %890 = vrot.lane.b32.xlu1 %v2910_v33, %s2492_s3 }
 0xc7d   :  { %734 = vrot.lane.b32.xlu1 %v2862_v23, %s2492_s3 }
 0xc81   :  { %578 = vrot.lane.b32.xlu1 %v2814_v4, %s2492_s3 }
 0xc85   :  { %421 = vrot.lane.b32.xlu1 %v2766_v58, %s2492_s3 }
 0xcdb   :  { %v1437_v16 = vpop.permute.xlu1 %1436 }
 0xcdc   :  { %1439 = vst.msk [vmem:[#allocation2 + $0x68] sm:$0xff] %vm424_vm4, %v1437_v16 }
 0xcdf   :  { %v1359_v19 = vpop.permute.xlu1 %1358 }
 0xce0   :  { %1361 = vst.msk [vmem:[#allocation2 + $0x60] sm:$0xff] %vm424_vm4, %v1359_v19 }
 0xce3   :  { %v1203_v20 = vpop.permute.xlu1 %1202  ;;  %v1617_v34 = vld [vmem:[#allocation2 + $0x68] sm:$0xff] }
 0xce4   :  { %1205 = vst.msk [vmem:[#allocation2 + $0x50] sm:$0xff] %vm424_vm4, %v1203_v20 }
 0xce7   :  { %v1047_v41 = vpop.permute.xlu1 %1046  ;;  %v1616_v36 = vld [vmem:[#allocation2 + $0x60] sm:$0xff] }
 0xce8   :  { %1049 = vst.msk [vmem:[#allocation2 + $0x40] sm:$0xff] %vm424_vm4, %v1047_v41 }
 0xceb   :  { %v891_v45 = vpop.permute.xlu1 %890  ;;  %v1614_v48 = vld [vmem:[#allocation2 + $0x50] sm:$0xff] }
 0xcec   :  { %893 = vst.msk [vmem:[#allocation2 + $0x30] sm:$0xff] %vm424_vm4, %v891_v45 }
 0xcef   :  { %v735_v4 = vpop.permute.xlu1 %734  ;;  %v1612_v52 = vld [vmem:[#allocation2 + $0x40] sm:$0xff] }
 0xcf0   :  { %737 = vst.msk [vmem:[#allocation2 + $0x20] sm:$0xff] %vm424_vm4, %v735_v4 }
 0xcf3   :  { %v579_v58 = vpop.permute.xlu1 %578  ;;  %v1610_v37 = vld [vmem:[#allocation2 + $0x30] sm:$0xff] }
 0xcf4   :  { %581 = vst.msk [vmem:[#allocation2 + $0x10] sm:$0xff] %vm424_vm4, %v579_v58 }
 0xcf7   :  { %v422_v17 = vpop.permute.xlu1 %421  ;;  %v1608_v55 = vld [vmem:[#allocation2 + $0x20] sm:$0xff] }
 0xcf8   :  { %425 = vst.msk [vmem:[#allocation2] sm:$0xff] %vm424_vm4, %v422_v17 }
 0xcff   :  { %v1604_v59 = vld [vmem:[#allocation2] sm:$0xff] }
 0xd29   :  { %v1508_v21 = vpop.f32.mrf.mxu1 }
 0xd2a   :  { %v1509_v22 = vadd.f32 %v1508_v21, %v251_v18 }
 0xd2b   :  { %v2350_v23 = vpop.f32.mrf.mxu1 }
 0xd2c   :  { %2442 = vtanh.f32 %v1509_v22 }
 0xd39   :  { %v2443_v24 = vpop.eup %2442 }
 0xd3a   :  { %2368 = vmatmul.mubr.msk.f32.vlgmr.msra.gmra.mxu0 %vm33_vm1, %v2443_v24 }
 0xdfa   :  { %v1589_v25 = vpop.f32.mrf.mxu0 }
 0xdfb   :  { %v1590_v26 = vadd.f32 %v2737_v44, %v1589_v25  ;;  %v1620_v44 = vld [vmem:[#allocation3] sm:$0x1] }
 0xdfc   :  { %v2369_v27 = vpop.f32.mrf.mxu0 }
 0xdfd   :  { %2444 = vtanh.f32 %v1590_v26 }
 0xe0a   :  { %v2445_v29 = vpop.eup %2444 }
 0xe0b   :  { %1595 = vrot.lane.b32.xlu0 %v2445_v29, %s2492_s3  ;;  %v1601_v43 = vsel %vm1520_vm7, %v2445_v29, %v2443_v24 }
 0xe0c   :  { %1602 = vst.msk [vmem:[#allocation6] sm:$0xff] %vm33_vm1, %v1601_v43 }
 0xe0f   :  { %1514 = vrot.lane.b32.xlu0 %v2443_v24, %s2492_s3 }
 0xe13   :  { %1280 = vrot.lane.b32.xlu0 %v3030_v3, %s2492_s3 }
 0xe17   :  { %1124 = vrot.lane.b32.xlu0 %v2982_v57, %s2492_s3  ;;  %v1606_v57 = vld [vmem:[#allocation2 + $0x10] sm:$0xff] }
 0xe1b   :  { %968 = vrot.lane.b32.xlu0 %v2934_v47, %s2492_s3 }
 0xe1f   :  { %812 = vrot.lane.b32.xlu0 %v2886_v28, %s2492_s3 }
 0xe23   :  { %656 = vrot.lane.b32.xlu0 %v2838_v14, %s2492_s3 }
 0xe27   :  { %500 = vrot.lane.b32.xlu0 %v2790_v63, %s2492_s3 }
 0xe2b   :  { %1623 = vperm.xlu0 %2411, %v1620_v44  }
 0xe7d   :  { %v1596_v30 = vpop.permute.xlu0 %1595 }
 0xe7e   :  { %1598 = vst.msk [vmem:[#allocation2 + $0x78] sm:$0xff] %vm424_vm4, %v1596_v30 }
 0xe81   :  { %v1515_v31 = vpop.permute.xlu0 %1514 }
 0xe82   :  { %1517 = vst.msk [vmem:[#allocation2 + $0x70] sm:$0xff] %vm424_vm4, %v1515_v31 }
 0xe85   :  { %v1281_v32 = vpop.permute.xlu0 %1280  ;;  %v1619_v33 = vld [vmem:[#allocation2 + $0x78] sm:$0xff] }
 0xe86   :  { %1283 = vst.msk [vmem:[#allocation2 + $0x58] sm:$0xff] %vm424_vm4, %v1281_v32  ;;  %2371 = vmatpush3.xpose.msk.msra.mxu1 %vm424_vm4, %v1619_v33 }
 0xe87   :  { %2372 = vmatprep.subr.mxu1 %v2490_v6 }
 0xe89   :  { %v1125_v14 = vpop.permute.xlu0 %1124  ;;  %v1618_v63 = vld [vmem:[#allocation2 + $0x70] sm:$0xff] }
 0xe8a   :  { %1127 = vst.msk [vmem:[#allocation2 + $0x48] sm:$0xff] %vm424_vm4, %v1125_v14  ;;  %2373 = vmatpush3.xpose.msk.msra.mxu1 %vm424_vm4, %v1618_v63 }
 0xe8b   :  { %2374 = vmatprep.subr.mxu1 %v2490_v6 }
 0xe8d   :  { %v969_v28 = vpop.permute.xlu0 %968  ;;  %v1615_v47 = vld [vmem:[#allocation2 + $0x58] sm:$0xff] }
 0xe8e   :  { %971 = vst.msk [vmem:[#allocation2 + $0x38] sm:$0xff] %vm424_vm4, %v969_v28  ;;  %2375 = vmatpush3.xpose.msk.msra.mxu1 %vm424_vm4, %v1617_v34 }
 0xe8f   :  { %2376 = vmatprep.subr.mxu1 %v2490_v6 }
 0xe91   :  { %v813_v35 = vpop.permute.xlu0 %812  ;;  %v1613_v49 = vld [vmem:[#allocation2 + $0x48] sm:$0xff] }
 0xe92   :  { %815 = vst.msk [vmem:[#allocation2 + $0x28] sm:$0xff] %vm424_vm4, %v813_v35  ;;  %2377 = vmatpush3.xpose.msk.msra.mxu1 %vm424_vm4, %v1616_v36 }
 0xe93   :  { %2378 = vmatprep.subr.mxu1 %v2490_v6 }
 0xe95   :  { %v657_v46 = vpop.permute.xlu0 %656  ;;  %v1611_v53 = vld [vmem:[#allocation2 + $0x38] sm:$0xff] }
 0xe96   :  { %659 = vst.msk [vmem:[#allocation2 + $0x18] sm:$0xff] %vm424_vm4, %v657_v46  ;;  %2379 = vmatpush3.xpose.msk.msra.mxu1 %vm424_vm4, %v1615_v47 }
 0xe97   :  { %2380 = vmatprep.subr.mxu1 %v2490_v6 }
 0xe99   :  { %v501_v38 = vpop.permute.xlu0 %500  ;;  %v1609_v54 = vld [vmem:[#allocation2 + $0x28] sm:$0xff] }
 0xe9a   :  { %503 = vst.msk [vmem:[#allocation2 + $0x8] sm:$0xff] %vm424_vm4, %v501_v38  ;;  %2381 = vmatpush3.xpose.msk.msra.mxu1 %vm424_vm4, %v1614_v48 }
 0xe9b   :  { %2382 = vmatprep.subr.mxu1 %v2490_v6 }
 0xe9d   :  { %v1607_v56 = vld [vmem:[#allocation2 + $0x18] sm:$0xff] }
 0xe9e   :  { %2383 = vmatpush3.xpose.msk.msra.mxu1 %vm424_vm4, %v1613_v49 }
 0xe9f   :  { %2384 = vmatprep.subr.mxu1 %v2490_v6 }
 0xea1   :  { %v1605_v40 = vld [vmem:[#allocation2 + $0x8] sm:$0xff] }
 0xea2   :  { %2385 = vmatpush3.xpose.msk.msra.mxu1 %vm424_vm4, %v1612_v52 }
 0xea3   :  { %2386 = vmatprep.subr.mxu1 %v2490_v6 }
 0xea6   :  { %2387 = vmatpush3.xpose.msk.msra.mxu1 %vm424_vm4, %v1611_v53 }
 0xea7   :  { %2388 = vmatprep.subr.mxu1 %v2490_v6 }
 0xeaa   :  { %2389 = vmatpush3.xpose.msk.msra.mxu1 %vm424_vm4, %v1610_v37 }
 0xeab   :  { %2390 = vmatprep.subr.mxu1 %v2490_v6 }
 0xeae   :  { %2391 = vmatpush3.xpose.msk.msra.mxu1 %vm424_vm4, %v1609_v54 }
 0xeaf   :  { %2392 = vmatprep.subr.mxu1 %v2490_v6 }
 0xeb2   :  { %2393 = vmatpush3.xpose.msk.msra.mxu1 %vm424_vm4, %v1608_v55 }
 0xeb3   :  { %2394 = vmatprep.subr.mxu1 %v2490_v6 }
 0xeb6   :  { %2395 = vmatpush3.xpose.msk.msra.mxu1 %vm424_vm4, %v1607_v56 }
 0xeb7   :  { %2396 = vmatprep.subr.mxu1 %v2490_v6 }
 0xeba   :  { %2397 = vmatpush3.xpose.msk.msra.mxu1 %vm424_vm4, %v1606_v57 }
 0xebb   :  { %2398 = vmatprep.subr.mxu1 %v2490_v6 }
 0xebe   :  { %2399 = vmatpush3.xpose.msk.msra.mxu1 %vm424_vm4, %v1605_v40 }
 0xebf   :  { %2400 = vmatprep.subr.mxu1 %v2490_v6 }
 0xec2   :  { %2401 = vmatpush3.xpose.msk.msra.mxu1 %vm424_vm4, %v1604_v59 }
 0xec5   :  { %2403 = vmatmul.mubr.msk.f32.vlgmr.msra.gmra.mxu1 %vm424_vm4, %v1603_v60 }
 0xec6   :  { %2457 = shalt.err (!%p2454_p4)
}
 0xec7   :  { %1771 = dma.vmem_to_hbm [thread:$0]  %s1769_s8, 128, %s3177_s7, [#allocation7]   ;;  %v1627_v6 = vshrl.u32 %v263_v50, 7  ;;  %v1624_v62 = vpop.permute.xlu0 %1623 }
 0xec8   :  { %s2495_s4 = smov [#allocation4]  }
 0xec9   :  { %v1628_v61 = vsub.s32 0, %v1627_v6  ;;  %s1758_s11 = sshll.u32 %s2495_s4, 4  ;;  %s1759_s11 = int_to_ptr.vmem [resolvable:$true] %s1758_s11 }
 0xeca   :  { %s2466_s1 = scalar_lea.vmem %s1759_s11, 16  ;;  %s2470_s12 = scalar_lea.vmem %s1759_s11, 32 }
 0xecb   :  { %v1629_v39 = vrot.slane %v1624_v62, %v1628_v61  ;;  %p2467_p5 = scmp.ne.s32.totalorder %s1759_s11, %s2466_s1  ;;  %p2471_p6 = scmp.lt.s32.totalorder %s1759_s11, %s1759_s11 }
 0xecc   :  { %p2472_p7 = scmp.lt.s32.totalorder %s2470_s12, %s2466_s1 }
 0xece   :  { %p2473_p8 = por %p2472_p7, %p2471_p6 }
 0xed0   :  { %p2474_p9 = pnand %p2473_p8, %p2467_p5 }
 0xf85   :  { %v1747_v0 = vpop.f32.mrf.mxu1 }
 0xf86   :  { %v1748_v1 = vadd.f32 %v1747_v0, %v1629_v39 }
 0xf87   :  { %v2404_v2 = vpop.f32.mrf.mxu1 }
 0xf88   :  { %1751 = vst [vmem:[#allocation4] sm:$0x1] %v1748_v1 }
 0xf89   :  { %2477 = shalt.err (!%p2474_p9)
}
 0xf8a   :  { %1761 = dma.vmem_to_hbm [thread:$0]  %s1759_s11, 16, %s3176_s6, [#allocation5]  }
 0xf8b   :  { %2486 = dma.done.wait [#allocation5], 16  }
 0xf8c   :  { %2487 = vsyncadd [#allocation5], 4294967280 }
 0xf8d   :  { %2488 = dma.done.wait [#allocation7], 128  }
 0xf8e   :  { %2489 = vsyncadd [#allocation7], 4294967168 }
 0xf8f   :  { %1778 = vsyncpa [#allocation5], 1 }
 0xf90   :  { %1779 = vsyncpa [#allocation7], 1 }

</bundles_post_ra>
